<compile_context>
chip_gen: v7x
topology: tpu7x:2x2x1
jax: 0.10.0
libtpu: 0.0.40
codegen_flags: <defaults>
</compile_context>

<pallas_src>
import functools

import jax
import jax.numpy as jnp
from jax import lax
from jax.experimental import pallas as pl
from jax.experimental.pallas import tpu as pltpu

_BN_EPS = 1e-5
_VMEM_PICK_BUDGET = 24 * 1024 * 1024      # budget used to choose the batch block

_CompilerParams = getattr(pltpu, "CompilerParams", None) or getattr(
    pltpu, "TPUCompilerParams", None)


# ----------------------------------------------------------------------------
# In-kernel helper
# ----------------------------------------------------------------------------
def _dw3x3_dense(xp_ref, w, shift, Nb, H, W):
    """Dense 3x3 depthwise conv over a zero-padded VMEM scratch (+ BN shift).

    xp_ref: (Nb, H+2, W+2, C) f32 scratch, 1-pixel zero border, interior holds
            the activation.  w: (3, 3, C) bf16.  shift: (1, C) f32.
    Returns (Nb, H, W, C) f32 (stride-1 "same" conv; caller subsamples).
    """
    acc = None
    for dy in range(3):
        for dx in range(3):
            tap = xp_ref[:, dy:dy + H, dx:dx + W, :]                # f32
            term = tap * w[dy:dy + 1, dx:dx + 1, :].astype(jnp.float32)
            acc = term if acc is None else acc + term
    return acc + shift


# ----------------------------------------------------------------------------
# Fused kernels (Nb batch elements per grid step)
# ----------------------------------------------------------------------------
def _block_s1_kernel(x1_ref, x2_ref, w1_ref, b1_ref, dw_ref, b2_ref,
                     w2_ref, b3_ref, se_ref, o_ref, xp_ref,
                     *, Nb, H, W, bf):
    """Stride-1 block: x1 passthrough + branch2 (pw1 -> dw3x3 -> pw2)."""
    M = Nb * H * W

    # branch2: 1x1 (+BN folded) + ReLU     (bf16 x bf16 -> f32 on the MXU)
    y = jnp.maximum(
        jnp.dot(x2_ref[...], w1_ref[...], preferred_element_type=jnp.float32)
        + b1_ref[...], 0.0)                                         # (M, bf)

    # Halo scratch: zero only once; the interior is overwritten every step and
    # the 1-pixel border is never written again (grid axis is "arbitrary").
    @pl.when(pl.program_id(0) == 0)
    def _():
        xp_ref[...] = jnp.zeros(xp_ref.shape, xp_ref.dtype)

    xp_ref[:, 1:H + 1, 1:W + 1, :] = y.reshape(Nb, H, W, bf)

    # branch2: 3x3 depthwise (+BN)
    z = _dw3x3_dense(xp_ref, dw_ref[...], b2_ref[...], Nb, H, W)
    z = z.reshape(M, bf).astype(jnp.bfloat16)

    # branch2: 1x1 (+BN) + ReLU with columns pre-scattered to ODD output lanes,
    # plus x1 passthrough scattered to EVEN lanes
    #   == concat + channel_shuffle(groups=2) folded into the weights.
    y2 = jnp.maximum(
        jnp.dot(z, w2_ref[...], preferred_element_type=jnp.float32)
        + b3_ref[...], 0.0)
    out = y2 + jnp.dot(x1_ref[...], se_ref[...],
                       preferred_element_type=jnp.float32)
    o_ref[...] = out.astype(o_ref.dtype)


def _block_down_kernel(x_ref, dw1_ref, db1_ref, w1_ref, bb1_ref,
                       pw1_ref, b1_ref, dw2_ref, db2_ref, w2_ref, bb2_ref,
                       o_ref, xp1_ref, xp2_ref, dn_ref,
                       *, Nb, H, W, Cin, bf, Cout, stride, Ho, Wo):
    """Stride>1 block: branch1 (dw -> pw, even lanes) + branch2 (pw -> dw -> pw,
    odd lanes).  Everything is computed dense in H,W with unit-stride taps; the
    conv stride is applied once at the end with a single strided read."""
    M = Nb * H * W
    x = x_ref[...]                                                  # (M, Cin) bf16

    @pl.when(pl.program_id(0) == 0)
    def _():
        xp1_ref[...] = jnp.zeros(xp1_ref.shape, xp1_ref.dtype)
        xp2_ref[...] = jnp.zeros(xp2_ref.shape, xp2_ref.dtype)

    # ---- branch1: dw3x3 (+BN) -> 1x1 (+BN) + ReLU  -> even output lanes ----
    xp1_ref[:, 1:H + 1, 1:W + 1, :] = x.astype(jnp.float32).reshape(Nb, H, W, Cin)
    a1 = _dw3x3_dense(xp1_ref, dw1_ref[...], db1_ref[...], Nb, H, W)
    z1 = a1.reshape(M, Cin).astype(jnp.bfloat16)
    dense = jnp.maximum(
        jnp.dot(z1, w1_ref[...], preferred_element_type=jnp.float32)
        + bb1_ref[...], 0.0)                                        # (M, Cout)

    # ---- branch2: 1x1 (+BN)+ReLU -> dw3x3 (+BN) -> 1x1 (+BN)+ReLU -> odd ----
    y = jnp.maximum(
        jnp.dot(x, pw1_ref[...], preferred_element_type=jnp.float32)
        + b1_ref[...], 0.0)                                         # (M, bf)
    xp2_ref[:, 1:H + 1, 1:W + 1, :] = y.reshape(Nb, H, W, bf)
    a2 = _dw3x3_dense(xp2_ref, dw2_ref[...], db2_ref[...], Nb, H, W)
    z2 = a2.reshape(M, bf).astype(jnp.bfloat16)
    dense = dense + jnp.maximum(
        jnp.dot(z2, w2_ref[...], preferred_element_type=jnp.float32)
        + bb2_ref[...], 0.0)

    # Apply the spatial stride ONCE (trades a few extra VPU/MXU rows for a
    # single strided sublane read instead of 9 strided taps per branch).
    dn_ref[...] = dense.reshape(Nb, H, W, Cout)
    o_ref[...] = dn_ref[:, pl.ds(0, Ho, stride=stride),
                        pl.ds(0, Wo, stride=stride), :].astype(o_ref.dtype)


# ----------------------------------------------------------------------------
# One-time parameter preparation (BN fold, shuffle fold, bf16 cast)
# ----------------------------------------------------------------------------
def _fold_bn(bn):
    scale = bn["gamma"] * lax.rsqrt(bn["var"] + _BN_EPS)
    shift = bn["beta"] - bn["mean"] * scale
    return scale, shift


def _scatter_cols(w, parity, cout):
    """Place column c of w at column 2*c + parity of a (K, cout) matrix."""
    return jnp.zeros((w.shape[0], cout), jnp.float32).at[:, parity::2].set(w)


def _scatter_vec(v, parity, cout):
    return jnp.zeros((cout,), jnp.float32).at[parity::2].set(v)


def prepare_inverted_residual_params(params, stride):
    """Model-load-time prep: fold eval-mode BN into the conv weights, fold the
    concat + channel_shuffle(groups=2) into the output-channel layout of the
    final 1x1 convs, and cast weights to bf16 for the MXU."""
    prep = {}
    p2 = params["branch2"]
    bf = p2["pw1_w"].shape[1]
    cout = 2 * bf
    s1, sh1 = _fold_bn(p2["bn1"])
    s2, sh2 = _fold_bn(p2["bn2"])
    s3, sh3 = _fold_bn(p2["bn3"])
    prep["pw1_w"] = (p2["pw1_w"] * s1[None, :]).astype(jnp.bfloat16)
    prep["pw1_b"] = sh1.reshape(1, bf).astype(jnp.float32)
    prep["dw2_w"] = (p2["dw_w"] * s2[None, None, :]).astype(jnp.bfloat16)
    prep["dw2_b"] = sh2.reshape(1, bf).astype(jnp.float32)
    prep["pw2_w"] = _scatter_cols(p2["pw2_w"] * s3[None, :], 1, cout
                                  ).astype(jnp.bfloat16)            # -> odd lanes
    prep["pw2_b"] = _scatter_vec(sh3, 1, cout).reshape(1, cout).astype(jnp.float32)

    if stride == 1:
        # x1 passthrough -> even output lanes (identity, fused channel shuffle)
        sel = jnp.zeros((bf, cout), jnp.float32).at[
            jnp.arange(bf), 2 * jnp.arange(bf)].set(1.0)
        prep["sel_even"] = sel.astype(jnp.bfloat16)
    else:
        p1 = params["branch1"]
        cin = p1["dw_w"].shape[-1]
        t1, th1 = _fold_bn(p1["bn1"])
        t2, th2 = _fold_bn(p1["bn2"])
        prep["dw1_w"] = (p1["dw_w"] * t1[None, None, :]).astype(jnp.bfloat16)
        prep["dw1_b"] = th1.reshape(1, cin).astype(jnp.float32)
        prep["pw_w"] = _scatter_cols(p1["pw_w"] * t2[None, :], 0, cout
                                     ).astype(jnp.bfloat16)         # -> even lanes
        prep["pw_b"] = _scatter_vec(th2, 0, cout).reshape(1, cout).astype(jnp.float32)
    return prep


# ----------------------------------------------------------------------------
# Wrapper: VMEM budgeting, batch blocking, pallas_call plumbing
# ----------------------------------------------------------------------------
def _padded_bytes(shape, dtype):
    """VMEM footprint of one buffer with (sublane, lane) tile padding."""
    it = jnp.dtype(dtype).itemsize
    sub = {4: 8, 2: 16, 1: 32}.get(it, 8)
    shape = (1,) + tuple(shape) if len(shape) == 1 else tuple(shape)
    lead = 1
    for d in shape[:-2]:
        lead *= int(d)
    rows = sub * (-(-int(shape[-2]) // sub))
    lanes = 128 * (-(-int(shape[-1]) // 128))
    return lead * rows * lanes * it


def _pick_nb(n, per_unit_bytes, fixed_bytes, budget=_VMEM_PICK_BUDGET):
    """Largest divisor of n whose per-step VMEM estimate fits the budget."""
    best = 1
    for nb in range(1, n + 1):
        if n % nb == 0 and fixed_bytes + nb * per_unit_bytes <= budget:
            best = nb
    return best


def _cparams(est_bytes):
    vmem_limit = int(min(56 << 20, max(32 << 20, 2 * est_bytes)))
    return _CompilerParams(dimension_semantics=("arbitrary",),
                           vmem_limit_bytes=vmem_limit)


def _forward_s1(x, prep):
    """x: (N, H, W, C) NHWC bf16; stride-1 block."""
    N, H, W, C = x.shape
    bf = C // 2
    HW = H * W
    xf = x.reshape(N * HW, C)
    x1 = xf[:, :bf]                    # lane-contiguous halves (wrapper-side)
    x2 = xf[:, bf:]

    per_unit = (2 * (2 * _padded_bytes((HW, bf), jnp.bfloat16)
                     + _padded_bytes((HW, C), jnp.bfloat16))
                + _padded_bytes((H + 2, W + 2, bf), jnp.float32))
    fixed = 2 * (3 * _padded_bytes((bf, C), jnp.bfloat16)
                 + _padded_bytes((9, bf), jnp.bfloat16)
                 + 3 * _padded_bytes((1, C), jnp.float32))
    Nb = _pick_nb(N, per_unit, fixed)

    def cspec(shape):
        return pl.BlockSpec(shape, lambda b: (0,) * len(shape))

    out = pl.pallas_call(
        functools.partial(_block_s1_kernel, Nb=Nb, H=H, W=W, bf=bf),
        out_shape=jax.ShapeDtypeStruct((N * HW, C), jnp.bfloat16),
        grid=(N // Nb,),
        in_specs=[
            pl.BlockSpec((Nb * HW, bf), lambda b: (b, 0)),   # x1
            pl.BlockSpec((Nb * HW, bf), lambda b: (b, 0)),   # x2
            cspec((bf, bf)),      # pw1_w
            cspec((1, bf)),       # pw1_b
            cspec((3, 3, bf)),    # dw2_w
            cspec((1, bf)),       # dw2_b
            cspec((bf, C)),       # pw2_w (odd lanes)
            cspec((1, C)),        # pw2_b
            cspec((bf, C)),       # sel_even
        ],
        out_specs=pl.BlockSpec((Nb * HW, C), lambda b: (b, 0)),
        scratch_shapes=[pltpu.VMEM((Nb, H + 2, W + 2, bf), jnp.float32)],
        compiler_params=_cparams(fixed + Nb * per_unit),
    )(x1, x2, prep["pw1_w"], prep["pw1_b"], prep["dw2_w"], prep["dw2_b"],
      prep["pw2_w"], prep["pw2_b"], prep["sel_even"])
    return out.reshape(N, H, W, C)


def _forward_down(x, prep, stride):
    """x: (N, H, W, Cin) NHWC bf16; stride>1 block (both branches)."""
    N, H, W, Cin = x.shape
    bf = prep["pw1_w"].shape[1]
    Cout = 2 * bf
    Ho = (H - 1) // stride + 1
    Wo = (W - 1) // stride + 1
    HW = H * W
    xf = x.reshape(N * HW, Cin)

    per_unit = (2 * (_padded_bytes((HW, Cin), jnp.bfloat16)
                     + _padded_bytes((Ho * Wo, Cout), jnp.bfloat16))
                + _padded_bytes((H + 2, W + 2, Cin), jnp.float32)
                + _padded_bytes((H + 2, W + 2, bf), jnp.float32)
                + _padded_bytes((H, W, Cout), jnp.float32))
    fixed = 2 * (_padded_bytes((Cin, Cout), jnp.bfloat16)
                 + _padded_bytes((Cin, bf), jnp.bfloat16)
                 + _padded_bytes((bf, Cout), jnp.bfloat16)
                 + 2 * _padded_bytes((9, max(Cin, bf)), jnp.bfloat16)
                 + 4 * _padded_bytes((1, Cout), jnp.float32))
    Nb = _pick_nb(N, per_unit, fixed)

    def cspec(shape):
        return pl.BlockSpec(shape, lambda b: (0,) * len(shape))

    out = pl.pallas_call(
        functools.partial(_block_down_kernel, Nb=Nb, H=H, W=W, Cin=Cin,
                          bf=bf, Cout=Cout, stride=stride, Ho=Ho, Wo=Wo),
        out_shape=jax.ShapeDtypeStruct((N, Ho, Wo, Cout), jnp.bfloat16),
        grid=(N // Nb,),
        in_specs=[
            pl.BlockSpec((Nb * HW, Cin), lambda b: (b, 0)),  # x
            cspec((3, 3, Cin)),   # dw1_w
            cspec((1, Cin)),      # dw1_b
            cspec((Cin, Cout)),   # pw_w  (branch1 1x1, even lanes)
            cspec((1, Cout)),     # pw_b
            cspec((Cin, bf)),     # pw1_w (branch2 first 1x1)
            cspec((1, bf)),       # pw1_b
            cspec((3, 3, bf)),    # dw2_w
            cspec((1, bf)),       # dw2_b
            cspec((bf, Cout)),    # pw2_w (branch2 second 1x1, odd lanes)
            cspec((1, Cout)),     # pw2_b
        ],
        out_specs=pl.BlockSpec((Nb, Ho, Wo, Cout), lambda b: (b, 0, 0, 0)),
        scratch_shapes=[pltpu.VMEM((Nb, H + 2, W + 2, Cin), jnp.float32),
                        pltpu.VMEM((Nb, H + 2, W + 2, bf), jnp.float32),
                        pltpu.VMEM((Nb, H, W, Cout), jnp.float32)],
        compiler_params=_cparams(fixed + Nb * per_unit),
    )(xf, prep["dw1_w"], prep["dw1_b"], prep["pw_w"], prep["pw_b"],
      prep["pw1_w"], prep["pw1_b"], prep["dw2_w"], prep["dw2_b"],
      prep["pw2_w"], prep["pw2_b"])
    return out


@functools.partial(jax.jit, static_argnames=("stride",))
def inverted_residual_forward(x_nchw, prep, stride):
    """Matches InvertedResidual.forward (eval-mode BN).  x: (N, C, H, W)."""
    x = jnp.transpose(x_nchw, (0, 2, 3, 1)).astype(jnp.bfloat16)   # NCHW -> NHWC
    if stride == 1:
        out = _forward_s1(x, prep)
    else:
        out = _forward_down(x, prep, stride)
    return jnp.transpose(out, (0, 3, 1, 2))                        # NHWC -> NCHW


# ----------------------------------------------------------------------------
# Parameter construction
# ----------------------------------------------------------------------------
def _make_bn(key, c):
    k1, k2, k3, k4 = jax.random.split(key, 4)
    return dict(gamma=jax.random.uniform(k1, (c,), minval=0.5, maxval=1.5),
                beta=jax.random.normal(k2, (c,)) * 0.1,
                mean=jax.random.normal(k3, (c,)) * 0.1,
                var=jax.random.uniform(k4, (c,), minval=0.5, maxval=1.5))


def make_inverted_residual_params(key, inp, oup, stride):
    assert 1 <= stride <= 3
    bf = oup // 2
    assert stride != 1 or inp == bf * 2
    keys = jax.random.split(key, 10)
    params = {}
    if stride > 1:
        params["branch1"] = dict(
            dw_w=jax.random.normal(keys[0], (3, 3, inp)) * 0.1,
            bn1=_make_bn(keys[1], inp),
            pw_w=jax.random.normal(keys[2], (inp, bf)) * 0.1,
            bn2=_make_bn(keys[3], bf))
    inp_b2 = inp if stride > 1 else bf
    params["branch2"] = dict(
        pw1_w=jax.random.normal(keys[4], (inp_b2, bf)) * 0.1,
        bn1=_make_bn(keys[5], bf),
        dw_w=jax.random.normal(keys[6], (3, 3, bf)) * 0.1,
        bn2=_make_bn(keys[7], bf),
        pw2_w=jax.random.normal(keys[8], (bf, bf)) * 0.1,
        bn3=_make_bn(keys[9], bf))
    return params


# ----------------------------------------------------------------------------
# Pure-JAX NCHW reference (mirrors the PyTorch code) for verification
# ----------------------------------------------------------------------------
def _ref_bn(x, bn):
    scale = bn["gamma"] / jnp.sqrt(bn["var"] + _BN_EPS)
    shift = bn["beta"] - bn["mean"] * scale
    return x * scale.reshape(1, -1, 1, 1) + shift.reshape(1, -1, 1, 1)


def _ref_pw(x, w):
    w_oihw = jnp.transpose(w, (1, 0))[:, :, None, None]
    return lax.conv_general_dilated(x, w_oihw, (1, 1), "VALID",
                                    dimension_numbers=("NCHW", "OIHW", "NCHW"))


def _ref_dw(x, w, stride):
    C = x.shape[1]
    w_oihw = jnp.transpose(w, (2, 0, 1))[:, None, :, :]
    return lax.conv_general_dilated(x, w_oihw, (stride, stride), ((1, 1), (1, 1)),
                                    dimension_numbers=("NCHW", "OIHW", "NCHW"),
                                    feature_group_count=C)


def _ref_channel_shuffle(x, groups):
    N, C, H, W = x.shape
    x = x.reshape(N, groups, C // groups, H, W)
    x = jnp.transpose(x, (0, 2, 1, 3, 4))
    return x.reshape(N, C, H, W)


def ref_forward(x, params, stride):
    def branch2(z):
        p = params["branch2"]
        z = jnp.maximum(_ref_bn(_ref_pw(z, p["pw1_w"]), p["bn1"]), 0.0)
        z = _ref_bn(_ref_dw(z, p["dw_w"], stride), p["bn2"])
        return jnp.maximum(_ref_bn(_ref_pw(z, p["pw2_w"]), p["bn3"]), 0.0)

    def branch1(z):
        p = params["branch1"]
        z = _ref_bn(_ref_dw(z, p["dw_w"], stride), p["bn1"])
        return jnp.maximum(_ref_bn(_ref_pw(z, p["pw_w"]), p["bn2"]), 0.0)

    if stride == 1:
        bf = x.shape[1] // 2
        out = jnp.concatenate([x[:, :bf], branch2(x[:, bf:])], axis=1)
    else:
        out = jnp.concatenate([branch1(x), branch2(x)], axis=1)
    return _ref_channel_shuffle(out, 2)


# ----------------------------------------------------------------------------
if __name__ == "__main__":
    key = jax.random.PRNGKey(0)
    kx1, kx2, kp1, kp2 = jax.random.split(key, 4)
    N, H, W = 2, 8, 8

    # stride = 1 : inp == oup == 2 * branch_features
    inp1, oup1 = 16, 16
    x1 = jax.random.normal(kx1, (N, inp1, H, W), jnp.float32)
    x1 = x1.astype(jnp.bfloat16).astype(jnp.float32)   # bf16-representable input
    params1 = make_inverted_residual_params(kp1, inp1, oup1, 1)
    prep1 = prepare_inverted_residual_params(params1, 1)
    out1 = jax.block_until_ready(inverted_residual_forward(x1, prep1, stride=1))
    ref1 = ref_forward(x1, params1, 1)
    assert out1.shape == (N, oup1, H, W), out1.shape
    err1 = float(jnp.max(jnp.abs(out1.astype(jnp.float32) - ref1)))
    assert jnp.allclose(out1.astype(jnp.float32), ref1, rtol=3e-2, atol=3e-2), (
        "stride=1 mismatch", err1)

    # stride = 2 : downsampling block with both branches
    inp2, oup2, s2 = 16, 32, 2
    x2 = jax.random.normal(kx2, (N, inp2, H, W), jnp.float32)
    x2 = x2.astype(jnp.bfloat16).astype(jnp.float32)
    params2 = make_inverted_residual_params(kp2, inp2, oup2, s2)
    prep2 = prepare_inverted_residual_params(params2, s2)
    out2 = jax.block_until_ready(inverted_residual_forward(x2, prep2, stride=s2))
    ref2 = ref_forward(x2, params2, s2)
    assert out2.shape == (N, oup2, H // 2, W // 2), out2.shape
    err2 = float(jnp.max(jnp.abs(out2.astype(jnp.float32) - ref2)))
    assert jnp.allclose(out2.astype(jnp.float32), ref2, rtol=3e-2, atol=3e-2), (
        "stride=2 mismatch", err2)

    print("KERNEL_OK")
</pallas_src>

<mosaic_0001>
module attributes {stable_mosaic.version = 11 : i64} {
  func.func @_block_s1_kernel(%arg0: i32, %arg1: memref<128x8xbf16, #tpu.memory_space<vmem>>, %arg2: memref<128x8xbf16, #tpu.memory_space<vmem>>, %arg3: memref<8x8xbf16, #tpu.memory_space<vmem>>, %arg4: memref<1x8xf32, #tpu.memory_space<vmem>>, %arg5: memref<3x3x8xbf16, #tpu.memory_space<vmem>>, %arg6: memref<1x8xf32, #tpu.memory_space<vmem>>, %arg7: memref<8x16xbf16, #tpu.memory_space<vmem>>, %arg8: memref<1x16xf32, #tpu.memory_space<vmem>>, %arg9: memref<8x16xbf16, #tpu.memory_space<vmem>>, %arg10: memref<128x16xbf16, #tpu.memory_space<vmem>>, %arg11: memref<2x10x10x8xf32, #tpu.memory_space<vmem>>) attributes {dimension_semantics = [#tpu.dimension_semantics<arbitrary>], iteration_bounds = array<i64: 1>, scalar_prefetch = 0 : i64, scratch_operands = 1 : i64, tpu.core_type = #tpu.core_type<tc>, window_params = [{transform_indices = @transform_0, window_bounds = array<i64: 128, 8>}, {transform_indices = @transform_1, window_bounds = array<i64: 128, 8>}, {pipeline_mode = #tpu.pipeline_mode<synchronous>, transform_indices = @transform_2, window_bounds = array<i64: 8, 8>}, {pipeline_mode = #tpu.pipeline_mode<synchronous>, transform_indices = @transform_3, window_bounds = array<i64: 1, 8>}, {pipeline_mode = #tpu.pipeline_mode<synchronous>, transform_indices = @transform_4, window_bounds = array<i64: 3, 3, 8>}, {pipeline_mode = #tpu.pipeline_mode<synchronous>, transform_indices = @transform_5, window_bounds = array<i64: 1, 8>}, {pipeline_mode = #tpu.pipeline_mode<synchronous>, transform_indices = @transform_6, window_bounds = array<i64: 8, 16>}, {pipeline_mode = #tpu.pipeline_mode<synchronous>, transform_indices = @transform_7, window_bounds = array<i64: 1, 16>}, {pipeline_mode = #tpu.pipeline_mode<synchronous>, transform_indices = @transform_8, window_bounds = array<i64: 8, 16>}, {transform_indices = @transform_9, window_bounds = array<i64: 128, 16>}]} {
    %c0 = arith.constant 0 : index
    %c0_0 = arith.constant 0 : index
    %0 = vector.load %arg2[%c0, %c0_0] : memref<128x8xbf16, #tpu.memory_space<vmem>>, vector<128x8xbf16>
    %c0_1 = arith.constant 0 : index
    %c0_2 = arith.constant 0 : index
    %1 = vector.load %arg3[%c0_1, %c0_2] : memref<8x8xbf16, #tpu.memory_space<vmem>>, vector<8x8xbf16>
    %cst = arith.constant dense<0.000000e+00> : vector<128x8xf32>
    %2 = tpu.matmul %0, %1, %cst {dimension_numbers = #tpu.dot_dimension_numbers<[1], [0], [0], [1], [0, 0, 1, 1], [], []>} : vector<128x8xbf16>, vector<8x8xbf16>, vector<128x8xf32> -> vector<128x8xf32>
    %c0_3 = arith.constant 0 : index
    %c0_4 = arith.constant 0 : index
    %3 = vector.load %arg4[%c0_3, %c0_4] : memref<1x8xf32, #tpu.memory_space<vmem>>, vector<1x8xf32>
    %4 = vector.broadcast %3 : vector<1x8xf32> to vector<128x8xf32>
    %5 = arith.addf %2, %4 : vector<128x8xf32>
    %cst_5 = arith.constant 0.000000e+00 : f32
    %6 = vector.broadcast %cst_5 : f32 to vector<128x8xf32>
    %7 = arith.maximumf %5, %6 : vector<128x8xf32>
    %c0_i32 = arith.constant 0 : i32
    %8 = arith.cmpi eq, %arg0, %c0_i32 : i32
    %9 = arith.extui %8 : i1 to i32
    %c0_i32_6 = arith.constant 0 : i32
    %10 = arith.cmpi ne, %9, %c0_i32_6 : i32
    scf.if %10 {
      %cst_63 = arith.constant 0.000000e+00 : f32
      %95 = vector.broadcast %cst_63 : f32 to vector<2x10x10x8xf32>
      %c0_64 = arith.constant 0 : index
      %c0_65 = arith.constant 0 : index
      %c0_66 = arith.constant 0 : index
      %c0_67 = arith.constant 0 : index
      %96 = vector.load %arg11[%c0_64, %c0_65, %c0_66, %c0_67] : memref<2x10x10x8xf32, #tpu.memory_space<vmem>>, vector<2x10x10x8xf32>
      tpu.vector_store %arg11[%c0_64, %c0_65, %c0_66, %c0_67], %95 {strides = array<i32>} : memref<2x10x10x8xf32, #tpu.memory_space<vmem>>, vector<2x10x10x8xf32>,
    } else {
    }
    %11 = vector.shape_cast %7 : vector<128x8xf32> to vector<2x8x8x8xf32>
    %c0_7 = arith.constant 0 : index
    %c1 = arith.constant 1 : index
    %c1_8 = arith.constant 1 : index
    %c0_9 = arith.constant 0 : index
    %12 = vector.load %arg11[%c0_7, %c1, %c1_8, %c0_9] : memref<2x10x10x8xf32, #tpu.memory_space<vmem>>, vector<2x8x8x8xf32>
    tpu.vector_store %arg11[%c0_7, %c1, %c1_8, %c0_9], %11 {strides = array<i32>} : memref<2x10x10x8xf32, #tpu.memory_space<vmem>>, vector<2x8x8x8xf32>,
    %c0_10 = arith.constant 0 : index
    %c0_11 = arith.constant 0 : index
    %c0_12 = arith.constant 0 : index
    %13 = vector.load %arg5[%c0_10, %c0_11, %c0_12] : memref<3x3x8xbf16, #tpu.memory_space<vmem>>, vector<3x3x8xbf16>
    %c0_13 = arith.constant 0 : index
    %c0_14 = arith.constant 0 : index
    %14 = vector.load %arg6[%c0_13, %c0_14] : memref<1x8xf32, #tpu.memory_space<vmem>>, vector<1x8xf32>
    %c0_15 = arith.constant 0 : index
    %c0_16 = arith.constant 0 : index
    %c0_17 = arith.constant 0 : index
    %c0_18 = arith.constant 0 : index
    %15 = vector.load %arg11[%c0_15, %c0_16, %c0_17, %c0_18] : memref<2x10x10x8xf32, #tpu.memory_space<vmem>>, vector<2x8x8x8xf32>
    %16 = vector.extract_strided_slice %13 {offsets = [0, 0, 0], sizes = [1, 1, 8], strides = [1, 1, 1]} : vector<3x3x8xbf16> to vector<1x1x8xbf16>
    %17 = arith.extf %16 : vector<1x1x8xbf16> to vector<1x1x8xf32>
    %18 = vector.shape_cast %17 : vector<1x1x8xf32> to vector<1x1x1x8xf32>
    %19 = vector.broadcast %18 : vector<1x1x1x8xf32> to vector<2x8x8x8xf32>
    %20 = arith.mulf %15, %19 : vector<2x8x8x8xf32>
    %c0_19 = arith.constant 0 : index
    %c0_20 = arith.constant 0 : index
    %c1_21 = arith.constant 1 : index
    %c0_22 = arith.constant 0 : index
    %21 = vector.load %arg11[%c0_19, %c0_20, %c1_21, %c0_22] : memref<2x10x10x8xf32, #tpu.memory_space<vmem>>, vector<2x8x8x8xf32>
    %22 = vector.extract_strided_slice %13 {offsets = [0, 1, 0], sizes = [1, 1, 8], strides = [1, 1, 1]} : vector<3x3x8xbf16> to vector<1x1x8xbf16>
    %23 = arith.extf %22 : vector<1x1x8xbf16> to vector<1x1x8xf32>
    %24 = vector.shape_cast %23 : vector<1x1x8xf32> to vector<1x1x1x8xf32>
    %25 = vector.broadcast %24 : vector<1x1x1x8xf32> to vector<2x8x8x8xf32>
    %26 = arith.mulf %21, %25 : vector<2x8x8x8xf32>
    %27 = arith.addf %20, %26 : vector<2x8x8x8xf32>
    %c0_23 = arith.constant 0 : index
    %c0_24 = arith.constant 0 : index
    %c2 = arith.constant 2 : index
    %c0_25 = arith.constant 0 : index
    %28 = vector.load %arg11[%c0_23, %c0_24, %c2, %c0_25] : memref<2x10x10x8xf32, #tpu.memory_space<vmem>>, vector<2x8x8x8xf32>
    %29 = vector.extract_strided_slice %13 {offsets = [0, 2, 0], sizes = [1, 1, 8], strides = [1, 1, 1]} : vector<3x3x8xbf16> to vector<1x1x8xbf16>
    %30 = arith.extf %29 : vector<1x1x8xbf16> to vector<1x1x8xf32>
    %31 = vector.shape_cast %30 : vector<1x1x8xf32> to vector<1x1x1x8xf32>
    %32 = vector.broadcast %31 : vector<1x1x1x8xf32> to vector<2x8x8x8xf32>
    %33 = arith.mulf %28, %32 : vector<2x8x8x8xf32>
    %34 = arith.addf %27, %33 : vector<2x8x8x8xf32>
    %c0_26 = arith.constant 0 : index
    %c1_27 = arith.constant 1 : index
    %c0_28 = arith.constant 0 : index
    %c0_29 = arith.constant 0 : index
    %35 = vector.load %arg11[%c0_26, %c1_27, %c0_28, %c0_29] : memref<2x10x10x8xf32, #tpu.memory_space<vmem>>, vector<2x8x8x8xf32>
    %36 = vector.extract_strided_slice %13 {offsets = [1, 0, 0], sizes = [1, 1, 8], strides = [1, 1, 1]} : vector<3x3x8xbf16> to vector<1x1x8xbf16>
    %37 = arith.extf %36 : vector<1x1x8xbf16> to vector<1x1x8xf32>
    %38 = vector.shape_cast %37 : vector<1x1x8xf32> to vector<1x1x1x8xf32>
    %39 = vector.broadcast %38 : vector<1x1x1x8xf32> to vector<2x8x8x8xf32>
    %40 = arith.mulf %35, %39 : vector<2x8x8x8xf32>
    %41 = arith.addf %34, %40 : vector<2x8x8x8xf32>
    %c0_30 = arith.constant 0 : index
    %c1_31 = arith.constant 1 : index
    %c1_32 = arith.constant 1 : index
    %c0_33 = arith.constant 0 : index
    %42 = vector.load %arg11[%c0_30, %c1_31, %c1_32, %c0_33] : memref<2x10x10x8xf32, #tpu.memory_space<vmem>>, vector<2x8x8x8xf32>
    %43 = vector.extract_strided_slice %13 {offsets = [1, 1, 0], sizes = [1, 1, 8], strides = [1, 1, 1]} : vector<3x3x8xbf16> to vector<1x1x8xbf16>
    %44 = arith.extf %43 : vector<1x1x8xbf16> to vector<1x1x8xf32>
    %45 = vector.shape_cast %44 : vector<1x1x8xf32> to vector<1x1x1x8xf32>
    %46 = vector.broadcast %45 : vector<1x1x1x8xf32> to vector<2x8x8x8xf32>
    %47 = arith.mulf %42, %46 : vector<2x8x8x8xf32>
    %48 = arith.addf %41, %47 : vector<2x8x8x8xf32>
    %c0_34 = arith.constant 0 : index
    %c1_35 = arith.constant 1 : index
    %c2_36 = arith.constant 2 : index
    %c0_37 = arith.constant 0 : index
    %49 = vector.load %arg11[%c0_34, %c1_35, %c2_36, %c0_37] : memref<2x10x10x8xf32, #tpu.memory_space<vmem>>, vector<2x8x8x8xf32>
    %50 = vector.extract_strided_slice %13 {offsets = [1, 2, 0], sizes = [1, 1, 8], strides = [1, 1, 1]} : vector<3x3x8xbf16> to vector<1x1x8xbf16>
    %51 = arith.extf %50 : vector<1x1x8xbf16> to vector<1x1x8xf32>
    %52 = vector.shape_cast %51 : vector<1x1x8xf32> to vector<1x1x1x8xf32>
    %53 = vector.broadcast %52 : vector<1x1x1x8xf32> to vector<2x8x8x8xf32>
    %54 = arith.mulf %49, %53 : vector<2x8x8x8xf32>
    %55 = arith.addf %48, %54 : vector<2x8x8x8xf32>
    %c0_38 = arith.constant 0 : index
    %c2_39 = arith.constant 2 : index
    %c0_40 = arith.constant 0 : index
    %c0_41 = arith.constant 0 : index
    %56 = vector.load %arg11[%c0_38, %c2_39, %c0_40, %c0_41] : memref<2x10x10x8xf32, #tpu.memory_space<vmem>>, vector<2x8x8x8xf32>
    %57 = vector.extract_strided_slice %13 {offsets = [2, 0, 0], sizes = [1, 1, 8], strides = [1, 1, 1]} : vector<3x3x8xbf16> to vector<1x1x8xbf16>
    %58 = arith.extf %57 : vector<1x1x8xbf16> to vector<1x1x8xf32>
    %59 = vector.shape_cast %58 : vector<1x1x8xf32> to vector<1x1x1x8xf32>
    %60 = vector.broadcast %59 : vector<1x1x1x8xf32> to vector<2x8x8x8xf32>
    %61 = arith.mulf %56, %60 : vector<2x8x8x8xf32>
    %62 = arith.addf %55, %61 : vector<2x8x8x8xf32>
    %c0_42 = arith.constant 0 : index
    %c2_43 = arith.constant 2 : index
    %c1_44 = arith.constant 1 : index
    %c0_45 = arith.constant 0 : index
    %63 = vector.load %arg11[%c0_42, %c2_43, %c1_44, %c0_45] : memref<2x10x10x8xf32, #tpu.memory_space<vmem>>, vector<2x8x8x8xf32>
    %64 = vector.extract_strided_slice %13 {offsets = [2, 1, 0], sizes = [1, 1, 8], strides = [1, 1, 1]} : vector<3x3x8xbf16> to vector<1x1x8xbf16>
    %65 = arith.extf %64 : vector<1x1x8xbf16> to vector<1x1x8xf32>
    %66 = vector.shape_cast %65 : vector<1x1x8xf32> to vector<1x1x1x8xf32>
    %67 = vector.broadcast %66 : vector<1x1x1x8xf32> to vector<2x8x8x8xf32>
    %68 = arith.mulf %63, %67 : vector<2x8x8x8xf32>
    %69 = arith.addf %62, %68 : vector<2x8x8x8xf32>
    %c0_46 = arith.constant 0 : index
    %c2_47 = arith.constant 2 : index
    %c2_48 = arith.constant 2 : index
    %c0_49 = arith.constant 0 : index
    %70 = vector.load %arg11[%c0_46, %c2_47, %c2_48, %c0_49] : memref<2x10x10x8xf32, #tpu.memory_space<vmem>>, vector<2x8x8x8xf32>
    %71 = vector.extract_strided_slice %13 {offsets = [2, 2, 0], sizes = [1, 1, 8], strides = [1, 1, 1]} : vector<3x3x8xbf16> to vector<1x1x8xbf16>
    %72 = arith.extf %71 : vector<1x1x8xbf16> to vector<1x1x8xf32>
    %73 = vector.shape_cast %72 : vector<1x1x8xf32> to vector<1x1x1x8xf32>
    %74 = vector.broadcast %73 : vector<1x1x1x8xf32> to vector<2x8x8x8xf32>
    %75 = arith.mulf %70, %74 : vector<2x8x8x8xf32>
    %76 = arith.addf %69, %75 : vector<2x8x8x8xf32>
    %77 = vector.shape_cast %14 : vector<1x8xf32> to vector<1x1x1x8xf32>
    %78 = vector.broadcast %77 : vector<1x1x1x8xf32> to vector<2x8x8x8xf32>
    %79 = arith.addf %76, %78 : vector<2x8x8x8xf32>
    %80 = vector.shape_cast %79 : vector<2x8x8x8xf32> to vector<128x8xf32>
    %81 = arith.truncf %80 : vector<128x8xf32> to vector<128x8xbf16>
    %c0_50 = arith.constant 0 : index
    %c0_51 = arith.constant 0 : index
    %82 = vector.load %arg7[%c0_50, %c0_51] : memref<8x16xbf16, #tpu.memory_space<vmem>>, vector<8x16xbf16>
    %cst_52 = arith.constant dense<0.000000e+00> : vector<128x16xf32>
    %83 = tpu.matmul %81, %82, %cst_52 {dimension_numbers = #tpu.dot_dimension_numbers<[1], [0], [0], [1], [0, 0, 1, 1], [], []>} : vector<128x8xbf16>, vector<8x16xbf16>, vector<128x16xf32> -> vector<128x16xf32>
    %c0_53 = arith.constant 0 : index
    %c0_54 = arith.constant 0 : index
    %84 = vector.load %arg8[%c0_53, %c0_54] : memref<1x16xf32, #tpu.memory_space<vmem>>, vector<1x16xf32>
    %85 = vector.broadcast %84 : vector<1x16xf32> to vector<128x16xf32>
    %86 = arith.addf %83, %85 : vector<128x16xf32>
    %cst_55 = arith.constant 0.000000e+00 : f32
    %87 = vector.broadcast %cst_55 : f32 to vector<128x16xf32>
    %88 = arith.maximumf %86, %87 : vector<128x16xf32>
    %c0_56 = arith.constant 0 : index
    %c0_57 = arith.constant 0 : index
    %89 = vector.load %arg1[%c0_56, %c0_57] : memref<128x8xbf16, #tpu.memory_space<vmem>>, vector<128x8xbf16>
    %c0_58 = arith.constant 0 : index
    %c0_59 = arith.constant 0 : index
    %90 = vector.load %arg9[%c0_58, %c0_59] : memref<8x16xbf16, #tpu.memory_space<vmem>>, vector<8x16xbf16>
    %cst_60 = arith.constant dense<0.000000e+00> : vector<128x16xf32>
    %91 = tpu.matmul %89, %90, %cst_60 {dimension_numbers = #tpu.dot_dimension_numbers<[1], [0], [0], [1], [0, 0, 1, 1], [], []>} : vector<128x8xbf16>, vector<8x16xbf16>, vector<128x16xf32> -> vector<128x16xf32>
    %92 = arith.addf %88, %91 : vector<128x16xf32>
    %93 = arith.truncf %92 : vector<128x16xf32> to vector<128x16xbf16>
    %c0_61 = arith.constant 0 : index
    %c0_62 = arith.constant 0 : index
    %94 = vector.load %arg10[%c0_61, %c0_62] : memref<128x16xbf16, #tpu.memory_space<vmem>>, vector<128x16xbf16>
    tpu.vector_store %arg10[%c0_61, %c0_62], %93 {strides = array<i32>} : memref<128x16xbf16, #tpu.memory_space<vmem>>, vector<128x16xbf16>,
    return
  }
  func.func @transform_0(%arg0: i32) -> (i32, i32) {
    %c0_i32 = arith.constant 0 : i32
    %c0_i32_0 = arith.constant 0 : i32
    return %arg0, %c0_i32 : i32, i32
  }
  func.func @transform_1(%arg0: i32) -> (i32, i32) {
    %c0_i32 = arith.constant 0 : i32
    %c0_i32_0 = arith.constant 0 : i32
    return %arg0, %c0_i32 : i32, i32
  }
  func.func @transform_2(%arg0: i32) -> (i32, i32) {
    %c0_i32 = arith.constant 0 : i32
    %c0_i32_0 = arith.constant 0 : i32
    %c0_i32_1 = arith.constant 0 : i32
    return %c0_i32, %c0_i32_0 : i32, i32
  }
  func.func @transform_3(%arg0: i32) -> (i32, i32) {
    %c0_i32 = arith.constant 0 : i32
    %c0_i32_0 = arith.constant 0 : i32
    %c0_i32_1 = arith.constant 0 : i32
    return %c0_i32, %c0_i32_0 : i32, i32
  }
  func.func @transform_4(%arg0: i32) -> (i32, i32, i32) {
    %c0_i32 = arith.constant 0 : i32
    %c0_i32_0 = arith.constant 0 : i32
    %c0_i32_1 = arith.constant 0 : i32
    %c0_i32_2 = arith.constant 0 : i32
    return %c0_i32, %c0_i32_0, %c0_i32_1 : i32, i32, i32
  }
  func.func @transform_5(%arg0: i32) -> (i32, i32) {
    %c0_i32 = arith.constant 0 : i32
    %c0_i32_0 = arith.constant 0 : i32
    %c0_i32_1 = arith.constant 0 : i32
    return %c0_i32, %c0_i32_0 : i32, i32
  }
  func.func @transform_6(%arg0: i32) -> (i32, i32) {
    %c0_i32 = arith.constant 0 : i32
    %c0_i32_0 = arith.constant 0 : i32
    %c0_i32_1 = arith.constant 0 : i32
    return %c0_i32, %c0_i32_0 : i32, i32
  }
  func.func @transform_7(%arg0: i32) -> (i32, i32) {
    %c0_i32 = arith.constant 0 : i32
    %c0_i32_0 = arith.constant 0 : i32
    %c0_i32_1 = arith.constant 0 : i32
    return %c0_i32, %c0_i32_0 : i32, i32
  }
  func.func @transform_8(%arg0: i32) -> (i32, i32) {
    %c0_i32 = arith.constant 0 : i32
    %c0_i32_0 = arith.constant 0 : i32
    %c0_i32_1 = arith.constant 0 : i32
    return %c0_i32, %c0_i32_0 : i32, i32
  }
  func.func @transform_9(%arg0: i32) -> (i32, i32) {
    %c0_i32 = arith.constant 0 : i32
    %c0_i32_0 = arith.constant 0 : i32
    return %arg0, %c0_i32 : i32, i32
  }
}

</mosaic_0001>

<bundles_post_ra>
// kernel: inverted_residual_forward.1
= control target key start
LH: loop header
LB: loop body
LE: loop exit
PB: predicated region body
PF: predicated region fallthrough
CT: control target
= control target key end

     0   :  { %vm123_vm0 = vcmask 1043456   ;;  %vm98_vm1 = vcmask 64512   ;;  %s1944_s0 = inlined_call_operand.vmem [shape: bf16[128,8], index: 0, kind: input, shape index: {}]   ;;  %s1945_s1 = inlined_call_operand.vmem [shape: bf16[128,8], index: 1, kind: input, shape index: {}]   ;;  %s1946_s2 = inlined_call_operand.vmem [shape: bf16[8,8], index: 2, kind: input, shape index: {}]   ;;  %s1947_s3 = inlined_call_operand.vmem [shape: f32[1,8], index: 3, kind: input, shape index: {}]   ;;  %s1948_s4 = inlined_call_operand.vmem [shape: bf16[3,3,8], index: 4, kind: input, shape index: {}]   ;;  %s1949_s5 = inlined_call_operand.vmem [shape: f32[1,8], index: 5, kind: input, shape index: {}]   ;;  %s1950_s6 = inlined_call_operand.vmem [shape: bf16[8,16], index: 6, kind: input, shape index: {}]   ;;  %s1951_s7 = inlined_call_operand.vmem [shape: f32[1,16], index: 7, kind: input, shape index: {}]   ;;  %s1952_s8 = inlined_call_operand.vmem [shape: bf16[8,16], index: 8, kind: input, shape index: {}]   ;;  %s1953_s9 = inlined_call_operand.hbm [shape: bf16[128,16], index: 9, kind: output, shape index: {}]  }
   0x1   :  { %v50_v0 = vld [vmem:[%s1946_s2] sm:$0xf]  ;;  %v1402_v4 = vld [vmem:[%s1945_s1 + $0x8] sm:$0xff]   ;;  %v1404_v6 = vld [vmem:[%s1945_s1 + $0x10] sm:$0xff]  }
   0x2   :  { %v1400_v1 = vld [vmem:[%s1945_s1] sm:$0xff]   ;;  %1392 = vmatprep.subr.msk.bf16.mxu0 %vm123_vm0, %v50_v0  ;;  %1393 = vmatprep.subr.msk.bf16.mxu1 %vm123_vm0, %v50_v0  ;;  %v125_v2 = vsel %vm123_vm0, %v50_v0, 0  ;;  %v1403_v5 = vld [vmem:[%s1945_s1 + $0x28] sm:$0xff]   ;;  %v1405_v7 = vld [vmem:[%s1945_s1 + $0x30] sm:$0xff]  }
   0x3   :  { %1337 = vmatpush3.bf16.msra.mxu0 %v125_v2  ;;  %1391 = vmatpush3.bf16.msra.mxu1 %v125_v2  ;;  %v1401_v3 = vld [vmem:[%s1945_s1 + $0x20] sm:$0xff]   ;;  %v1406_v8 = vld [vmem:[%s1945_s1 + $0x18] sm:$0xff]  }
   0x4   :  { %1338 = vmatprep.mubr.msk.bf16.mxu0 %vm98_vm1, %v1400_v1  ;;  %1346 = vmatprep.mubr.msk.bf16.mxu1 %vm98_vm1, %v1401_v3  ;;  %v1407_v9 = vld [vmem:[%s1945_s1 + $0x38] sm:$0xff]  }
   0x6   :  { %1339 = vmatmul.mubr.msk.bf16.vlgmr.msra.gmra.mrb[0].mxu0 %vm98_vm1, %v1402_v4  ;;  %1347 = vmatmul.mubr.msk.bf16.vlgmr.msra.gmra.mrb[0].mxu1 %vm98_vm1, %v1403_v5 }
   0x7   :  { %1342 = vmatprep.mubr.msk.bf16.mxu0 %vm98_vm1, %v1404_v6  ;;  %1350 = vmatprep.mubr.msk.bf16.mxu1 %vm98_vm1, %v1405_v7 }
   0xe   :  { %1343 = vmatmul.mubr.msk.bf16.gmra.mrb[4].mxu0 %vm98_vm1, %v1406_v8  ;;  %1351 = vmatmul.mubr.msk.bf16.gmra.mrb[4].mxu1 %vm98_vm1, %v1407_v9 }
   0xf   :  { %14 = vsyncpa [#allocation4], 0  ;;  %vm245_vm2 = vcmask 58368   ;;  %v1440_v10 = vmov 0.0   ;;  %v792_v11 = vld [vmem:[%s1950_s6] sm:$0xf]  ;;  %v323_v23 = vlaneseq }
  0x10   :  { %251 = vst.msk [vmem:[#allocation2 + $0x30] sm:$0xff] %vm98_vm1, %v1440_v10  ;;  %244 = vst.msk [vmem:[#allocation2] sm:$0xff] %vm98_vm1, %v1440_v10  ;;  %v956_v12 = vld [vmem:[%s1952_s8] sm:$0xf]  ;;  %1394 = vmatprep.subr.msk.bf16.mxu1 %vm123_vm0, %v792_v11  ;;  %v825_v13 = vsel %vm123_vm0, %v792_v11, 0  ;;  %v1409_v16 = vld [vmem:[%s1944_s0 + $0x8] sm:$0xff]  }
  0x11   :  { %252 = vst.msk [vmem:[#allocation2 + $0x38] sm:$0x3] %vm245_vm2, %v1440_v10  ;;  %246 = vst.msk [vmem:[#allocation2 + $0x8] sm:$0x3] %vm245_vm2, %v1440_v10  ;;  %1395 = vmatprep.subr.msk.bf16.mxu0 %vm123_vm0, %v956_v12  ;;  %v1022_v14 = vsel %vm123_vm0, %v956_v12, 0  ;;  %1355 = vmatpush3.bf16.msra.mxu1 %v825_v13  ;;  %v1408_v15 = vld [vmem:[%s1944_s0] sm:$0xff]  }
  0x12   :  { %247 = vst.msk [vmem:[#allocation2 + $0x10] sm:$0xff] %vm98_vm1, %v1440_v10  ;;  %249 = vst.msk [vmem:[#allocation2 + $0x20] sm:$0xff] %vm98_vm1, %v1440_v10  ;;  %1373 = vmatpush3.bf16.msra.mxu0 %v1022_v14  ;;  %1374 = vmatprep.mubr.msk.bf16.mxu0 %vm98_vm1, %v1408_v15  ;;  %v1410_v17 = vld [vmem:[%s1944_s0 + $0x10] sm:$0xff]   ;;  %v1411_v18 = vld [vmem:[%s1944_s0 + $0x18] sm:$0xff]   ;;  %v324_v24 = vshrl.u32 %v323_v23, 7  ;;  %vm1201_vm3 = vcmask 125952  }
  0x13   :  { %248 = vst.msk [vmem:[#allocation2 + $0x18] sm:$0x3] %vm245_vm2, %v1440_v10  ;;  %250 = vst.msk [vmem:[#allocation2 + $0x28] sm:$0x3] %vm245_vm2, %v1440_v10  ;;  %v1412_v19 = vld [vmem:[%s1944_s0 + $0x20] sm:$0xff]   ;;  %v1413_v20 = vld [vmem:[%s1944_s0 + $0x28] sm:$0xff]  }
  0x14   :  { %253 = vst.msk [vmem:[#allocation2 + $0x40] sm:$0xff] %vm98_vm1, %v1440_v10  ;;  %255 = vst.msk [vmem:[#allocation2 + $0x50] sm:$0xff] %vm98_vm1, %v1440_v10  ;;  %v1414_v21 = vld [vmem:[%s1944_s0 + $0x30] sm:$0xff]   ;;  %v1415_v22 = vld [vmem:[%s1944_s0 + $0x38] sm:$0xff]   ;;  %v325_v27 = vsub.s32 0, %v324_v24  ;;  %v361_v28 = vsub.s32 1, %v324_v24 }
  0x15   :  { %254 = vst.msk [vmem:[#allocation2 + $0x48] sm:$0x3] %vm245_vm2, %v1440_v10  ;;  %256 = vst.msk [vmem:[#allocation2 + $0x58] sm:$0x3] %vm245_vm2, %v1440_v10  ;;  %v302_v25 = vld [vmem:[%s1948_s4] sm:$0x3] }
  0x16   :  { %257 = vst.msk [vmem:[#allocation2 + $0x60] sm:$0xff] %vm98_vm1, %v1440_v10  ;;  %259 = vst.msk [vmem:[#allocation2 + $0x70] sm:$0xff] %vm98_vm1, %v1440_v10  ;;  %1375 = vmatmul.mubr.msk.bf16.vlgmr.msra.gmra.mrb[8].mxu0 %vm98_vm1, %v1409_v16  ;;  %v322_v26 = vunpack.c.l.bf16 %v302_v25  ;;  %v1621_v31 = vsub.s32 2, %v324_v24  ;;  %v1626_v36 = vld [vmem:[%s1947_s3] ss:$0 sm:$0xff] }
  0x17   :  { %258 = vst.msk [vmem:[#allocation2 + $0x68] sm:$0x3] %vm245_vm2, %v1440_v10  ;;  %260 = vst.msk [vmem:[#allocation2 + $0x78] sm:$0x3] %vm245_vm2, %v1440_v10  ;;  %1378 = vmatprep.mubr.msk.bf16.mxu0 %vm98_vm1, %v1410_v17  ;;  %v306_v32 = vld [vmem:[#allocation2] sm:$0xff] }
  0x18   :  { %261 = vst.msk [vmem:[#allocation2 + $0x80] sm:$0xff] %vm98_vm1, %v1440_v10  ;;  %263 = vst.msk [vmem:[#allocation2 + $0x90] sm:$0xff] %vm98_vm1, %v1440_v10  ;;  %v1617_v29 = vrot.slane %v322_v26, %v325_v27  ;;  %v1619_v30 = vrot.slane %v322_v26, %v361_v28  ;;  %v343_v33 = vld [vmem:[#allocation2 + $0x1] sm:$0xff]  ;;  %v1637_v41 = vrot.slane %v322_v26, %v1621_v31 }
  0x19   :  { %262 = vst.msk [vmem:[#allocation2 + $0x88] sm:$0x3] %vm245_vm2, %v1440_v10  ;;  %264 = vst.msk [vmem:[#allocation2 + $0x98] sm:$0x3] %vm245_vm2, %v1440_v10  ;;  %v303_v37 = vld [vmem:[%s1948_s4 + $0x2] sm:$0x3] }
  0x1a   :  { %265 = vst.msk [vmem:[#allocation2 + $0xa0] sm:$0xff] %vm98_vm1, %v1440_v10  ;;  %267 = vst.msk [vmem:[#allocation2 + $0xb0] sm:$0xff] %vm98_vm1, %v1440_v10  ;;  %v304_v38 = vld [vmem:[%s1948_s4 + $0x4] sm:$0x3]  ;;  %v327_v39 = vmul.f32 %v1617_v29, %v306_v32  ;;  %v363_v40 = vmul.f32 %v1619_v30, %v343_v33  ;;  %v463_v49 = vunpack.c.l.bf16 %v303_v37 }
  0x1b   :  { %266 = vst.msk [vmem:[#allocation2 + $0xa8] sm:$0x3] %vm245_vm2, %v1440_v10  ;;  %268 = vst.msk [vmem:[#allocation2 + $0xb8] sm:$0x3] %vm245_vm2, %v1440_v10  ;;  %v395_v42 = vld [vmem:[#allocation2 + $0x2] sm:$0xff]  ;;  %v621_v50 = vunpack.c.l.bf16 %v304_v38 }
  0x1c   :  { %269 = vst.msk [vmem:[#allocation2 + $0xc0] sm:$0xff] %vm98_vm1, %v1440_v10  ;;  %271 = vst.msk [vmem:[#allocation2 + $0xd0] sm:$0xff] %vm98_vm1, %v1440_v10  ;;  %v379_v55 = vadd.f32 %v363_v40, %v327_v39  ;;  %v415_v56 = vmul.f32 %v1637_v41, %v395_v42  ;;  %v1656_v12 = vrot.slane %v463_v49, %v325_v27 }
  0x1d   :  { %270 = vst.msk [vmem:[#allocation2 + $0xc8] sm:$0x3] %vm245_vm2, %v1440_v10  ;;  %272 = vst.msk [vmem:[#allocation2 + $0xd8] sm:$0x3] %vm245_vm2, %v1440_v10  ;;  %v1660_v16 = vrot.slane %v463_v49, %v361_v28  ;;  %v1663_v17 = vrot.slane %v463_v49, %v1621_v31  ;;  %v1672_v25 = vrot.slane %v621_v50, %v1621_v31 }
  0x1e   :  { %273 = vst.msk [vmem:[#allocation2 + $0xe0] sm:$0xff] %vm98_vm1, %v1440_v10  ;;  %275 = vst.msk [vmem:[#allocation2 + $0xf0] sm:$0xff] %vm98_vm1, %v1440_v10  ;;  %1379 = vmatmul.mubr.msk.bf16.gmra.mrb[12].mxu0 %vm98_vm1, %v1411_v18  ;;  %v1665_v18 = vrot.slane %v621_v50, %v325_v27  ;;  %v431_v24 = vadd.f32 %v415_v56, %v379_v55 }
  0x1f   :  { %274 = vst.msk [vmem:[#allocation2 + $0xe8] sm:$0x3] %vm245_vm2, %v1440_v10  ;;  %276 = vst.msk [vmem:[#allocation2 + $0xf8] sm:$0x3] %vm245_vm2, %v1440_v10  ;;  %1382 = vmatprep.mubr.msk.bf16.mxu0 %vm98_vm1, %v1412_v19  ;;  %v612_v13 = vld [vmem:[#allocation2 + $0x90] sm:$0xff]  ;;  %v1667_v19 = vrot.slane %v621_v50, %v361_v28 }
  0x20   :  { %277 = vst.msk [vmem:[#allocation2 + $0x100] sm:$0xff] %vm98_vm1, %v1440_v10  ;;  %279 = vst.msk [vmem:[#allocation2 + $0x110] sm:$0xff] %vm98_vm1, %v1440_v10  ;;  %v665_v14 = vld [vmem:[#allocation2 + $0x91] sm:$0xff] }
  0x21   :  { %278 = vst.msk [vmem:[#allocation2 + $0x108] sm:$0x3] %vm245_vm2, %v1440_v10  ;;  %280 = vst.msk [vmem:[#allocation2 + $0x118] sm:$0x3] %vm245_vm2, %v1440_v10  ;;  %v314_v34 = vld [vmem:[#allocation2 + $0xa0] sm:$0xff] }
  0x22   :  { %281 = vst.msk [vmem:[#allocation2 + $0x120] sm:$0xff] %vm98_vm1, %v1440_v10  ;;  %283 = vst.msk [vmem:[#allocation2 + $0x130] sm:$0xff] %vm98_vm1, %v1440_v10  ;;  %v351_v35 = vld [vmem:[#allocation2 + $0xa1] sm:$0xff]  ;;  %v335_v43 = vmul.f32 %v1617_v29, %v314_v34  ;;  %v1679_v34 = vmul.f32 %v1665_v18, %v612_v13 }
  0x23   :  { %282 = vst.msk [vmem:[#allocation2 + $0x128] sm:$0x3] %vm245_vm2, %v1440_v10  ;;  %284 = vst.msk [vmem:[#allocation2 + $0x138] sm:$0x3] %vm245_vm2, %v1440_v10  ;;  %v371_v44 = vmul.f32 %v1619_v30, %v351_v35  ;;  %v403_v57 = vld [vmem:[#allocation2 + $0xa2] sm:$0xff]  ;;  %v1682_v35 = vmul.f32 %v1667_v19, %v665_v14 }
  0x24   :  { %v423_v8 = vmul.f32 %v1637_v41, %v403_v57 }
  0x25   :  { %v387_v63 = vadd.f32 %v371_v44, %v335_v43 }
  0x26   :  { %1383 = vmatmul.mubr.msk.bf16.gmra.mrb[16].mxu0 %vm98_vm1, %v1413_v20  ;;  %v717_v20 = vld [vmem:[#allocation2 + $0x92] sm:$0xff] }
  0x27   :  { %1386 = vmatprep.mubr.msk.bf16.mxu0 %vm98_vm1, %v1414_v21  ;;  %v1674_v26 = vadd.f32 %v423_v8, %v387_v63  ;;  %v1687_v42 = vmul.f32 %v1672_v25, %v717_v20 }
  0x2e   :  { %1387 = vmatmul.mubr.msk.bf16.gmra.mrb[20].mxu0 %vm98_vm1, %v1415_v22 }
  0xd9   :  { %v1340_v45 = vpop.f32.mrb[0].mxu0  ;;  %v1348_v47 = vpop.f32.mrb[0].mxu1 }
  0xda   :  { %v170_v46 = vadd.f32 %v1340_v45, %v1626_v36  ;;  %v161_v48 = vpop.f32.mrb[1].mxu0  ;;  %v202_v51 = vadd.f32 %v1348_v47, %v1626_v36  ;;  %v193_v53 = vpop.f32.mrb[1].mxu1 }
  0xdb   :  { %v162_v52 = vadd.f32 %v1626_v36, %v161_v48  ;;  %v1341_v54 = vpop.f32.mrb[2].mxu0  ;;  %v194_v59 = vadd.f32 %v1626_v36, %v193_v53  ;;  %v1349_v61 = vpop.f32.mrb[2].mxu1 }
  0xdc   :  { %v226_v58 = vmax.f32 %v170_v46, 0.0  ;;  %v173_v60 = vadd.f32 %v1341_v54, %v1626_v36  ;;  %v164_v62 = vpop.f32.mrb[3].mxu0  ;;  %v234_v0 = vmax.f32 %v202_v51, 0.0  ;;  %v205_v2 = vadd.f32 %v1349_v61, %v1626_v36  ;;  %v196_v4 = vpop.f32.mrb[3].mxu1 }
  0xdd   :  { %v224_v1 = vmax.f32 %v162_v52, 0.0  ;;  %v165_v3 = vadd.f32 %v1626_v36, %v164_v62  ;;  %v232_v5 = vmax.f32 %v194_v59, 0.0  ;;  %v197_v7 = vadd.f32 %v1626_v36, %v196_v4 }
  0xde   :  { %288 = vst.msk [vmem:[#allocation2 + $0x31] sm:$0xff] %vm98_vm1, %v226_v58  ;;  %v227_v6 = vmax.f32 %v173_v60, 0.0  ;;  %296 = vst.msk [vmem:[#allocation2 + $0xd1] sm:$0xff] %vm98_vm1, %v234_v0  ;;  %v235_v9 = vmax.f32 %v205_v2, 0.0 }
  0xdf   :  { %286 = vst.msk [vmem:[#allocation2 + $0x11] sm:$0xff] %vm98_vm1, %v224_v1  ;;  %v225_v10 = vmax.f32 %v165_v3, 0.0  ;;  %294 = vst.msk [vmem:[#allocation2 + $0xb1] sm:$0xff] %vm98_vm1, %v232_v5  ;;  %v233_v11 = vmax.f32 %v197_v7, 0.0 }
  0xe0   :  { %289 = vst.msk [vmem:[#allocation2 + $0x41] sm:$0xff] %vm98_vm1, %v227_v6  ;;  %297 = vst.msk [vmem:[#allocation2 + $0xe1] sm:$0xff] %vm98_vm1, %v235_v9 }
  0xe1   :  { %287 = vst.msk [vmem:[#allocation2 + $0x21] sm:$0xff] %vm98_vm1, %v225_v10  ;;  %v1344_v15 = vpop.f32.mrb[4].mxu0  ;;  %295 = vst.msk [vmem:[#allocation2 + $0xc1] sm:$0xff] %vm98_vm1, %v233_v11  ;;  %v1352_v22 = vpop.f32.mrb[4].mxu1 }
  0xe2   :  { %v186_v21 = vadd.f32 %v1344_v15, %v1626_v36  ;;  %v177_v23 = vpop.f32.mrb[5].mxu0  ;;  %v218_v32 = vadd.f32 %v1352_v22, %v1626_v36  ;;  %v209_v33 = vpop.f32.mrb[5].mxu1 }
  0xe3   :  { %v178_v27 = vadd.f32 %v1626_v36, %v177_v23  ;;  %v1345_v28 = vpop.f32.mrb[6].mxu0  ;;  %v210_v38 = vadd.f32 %v1626_v36, %v209_v33  ;;  %v1353_v39 = vpop.f32.mrb[6].mxu1 }
  0xe4   :  { %v230_v37 = vmax.f32 %v186_v21, 0.0  ;;  %v189_v31 = vadd.f32 %v1345_v28, %v1626_v36  ;;  %v180_v40 = vpop.f32.mrb[7].mxu0  ;;  %v238_v43 = vmax.f32 %v218_v32, 0.0  ;;  %v221_v45 = vadd.f32 %v1353_v39, %v1626_v36  ;;  %v212_v47 = vpop.f32.mrb[7].mxu1 }
  0xe5   :  { %v228_v44 = vmax.f32 %v178_v27, 0.0  ;;  %v181_v46 = vadd.f32 %v1626_v36, %v180_v40  ;;  %v606_v48 = vld [vmem:[#allocation2 + $0x30] sm:$0xff]  ;;  %v236_v49 = vmax.f32 %v210_v38, 0.0  ;;  %v213_v51 = vadd.f32 %v1626_v36, %v212_v47 }
  0xe6   :  { %292 = vst.msk [vmem:[#allocation2 + $0x71] sm:$0xff] %vm98_vm1, %v230_v37  ;;  %v231_v50 = vmax.f32 %v189_v31, 0.0  ;;  %v307_v52 = vld [vmem:[#allocation2 + $0x10] sm:$0xff]  ;;  %v1694_v55 = vmul.f32 %v1665_v18, %v606_v48  ;;  %300 = vst.msk [vmem:[#allocation2 + $0x111] sm:$0xff] %vm98_vm1, %v238_v43  ;;  %v239_v56 = vmax.f32 %v221_v45, 0.0  ;;  %v330_v32 = vmul.f32 %v606_v48, %v1617_v29 }
  0xe7   :  { %v344_v53 = vld [vmem:[#allocation2 + $0x11] sm:$0xff]  ;;  %290 = vst.msk [vmem:[#allocation2 + $0x51] sm:$0xff] %vm98_vm1, %v228_v44  ;;  %v229_v57 = vmax.f32 %v181_v46, 0.0  ;;  %v328_v58 = vmul.f32 %v1617_v29, %v307_v52  ;;  %298 = vst.msk [vmem:[#allocation2 + $0xf1] sm:$0xff] %vm98_vm1, %v236_v49  ;;  %v237_v36 = vmax.f32 %v213_v51, 0.0  ;;  %v468_v0 = vmul.f32 %v1656_v12, %v307_v52  ;;  %v450_v21 = vld [vmem:[#allocation2 + $0x40] sm:$0xff] }
  0xe8   :  { %v396_v54 = vld [vmem:[#allocation2 + $0x12] sm:$0xff]  ;;  %v364_v59 = vmul.f32 %v1619_v30, %v344_v53  ;;  %293 = vst.msk [vmem:[#allocation2 + $0x81] sm:$0xff] %vm98_vm1, %v231_v50  ;;  %v448_v63 = vld [vmem:[#allocation2 + $0x20] sm:$0xff]  ;;  %v520_v2 = vmul.f32 %v1660_v16, %v344_v53  ;;  %301 = vst.msk [vmem:[#allocation2 + $0x121] sm:$0xff] %vm98_vm1, %v239_v56  ;;  %v470_v43 = vmul.f32 %v606_v48, %v1656_v12 }
  0xe9   :  { %v659_v60 = vld [vmem:[#allocation2 + $0x31] sm:$0xff]  ;;  %v416_v62 = vmul.f32 %v1637_v41, %v396_v54  ;;  %v501_v1 = vld [vmem:[#allocation2 + $0x21] sm:$0xff]  ;;  %291 = vst.msk [vmem:[#allocation2 + $0x61] sm:$0xff] %vm98_vm1, %v229_v57  ;;  %v469_v5 = vmul.f32 %v1656_v12, %v448_v63  ;;  %v572_v7 = vmul.f32 %v1663_v17, %v396_v54  ;;  %299 = vst.msk [vmem:[#allocation2 + $0x101] sm:$0xff] %vm98_vm1, %v237_v36 }
  0xea   :  { %v711_v61 = vld [vmem:[#allocation2 + $0x32] sm:$0xff]  ;;  %v553_v3 = vld [vmem:[#allocation2 + $0x22] sm:$0xff]  ;;  %v380_v4 = vadd.f32 %v364_v59, %v328_v58  ;;  %v521_v6 = vmul.f32 %v1660_v16, %v501_v1  ;;  %v484_v8 = vadd.f32 %v468_v0, %v431_v24  ;;  %v626_v10 = vmul.f32 %v1665_v18, %v448_v63 }
  0xeb   :  { %v573_v9 = vmul.f32 %v1663_v17, %v553_v3  ;;  %v678_v11 = vmul.f32 %v1667_v19, %v501_v1  ;;  %v679_v14 = vmul.f32 %v1667_v19, %v659_v60  ;;  %v730_v15 = vmul.f32 %v1672_v25, %v553_v3  ;;  %v503_v27 = vld [vmem:[#allocation2 + $0x41] sm:$0xff] }
  0xec   :  { %v432_v13 = vadd.f32 %v416_v62, %v380_v4  ;;  %v731_v20 = vmul.f32 %v1672_v25, %v711_v61  ;;  %v536_v22 = vadd.f32 %v520_v2, %v484_v8  ;;  %v329_v23 = vmul.f32 %v448_v63, %v1617_v29  ;;  %v555_v31 = vld [vmem:[#allocation2 + $0x42] sm:$0xff] }
  0xed   :  { %v365_v24 = vmul.f32 %v501_v1, %v1619_v30  ;;  %v366_v28 = vmul.f32 %v659_v60, %v1619_v30  ;;  %v417_v37 = vmul.f32 %v553_v3, %v1637_v41  ;;  %v418_v38 = vmul.f32 %v711_v61, %v1637_v41  ;;  %v1736_v1 = vld [vmem:[%s1949_s5] ss:$0 sm:$0xff] }
  0xee   :  { %v485_v33 = vadd.f32 %v469_v5, %v432_v13  ;;  %v588_v39 = vadd.f32 %v572_v7, %v536_v22  ;;  %v471_v44 = vmul.f32 %v1656_v12, %v450_v21  ;;  %v608_v45 = vld [vmem:[#allocation2 + $0x50] sm:$0xff]  ;;  %v522_v49 = vmul.f32 %v659_v60, %v1660_v16 }
  0xef   :  { %v381_v40 = vadd.f32 %v365_v24, %v329_v23  ;;  %v382_v47 = vadd.f32 %v366_v28, %v330_v32  ;;  %v523_v50 = vmul.f32 %v1660_v16, %v503_v27  ;;  %v661_v51 = vld [vmem:[#allocation2 + $0x51] sm:$0xff]  ;;  %v574_v54 = vmul.f32 %v711_v61, %v1663_v17 }
  0xf0   :  { %v537_v46 = vadd.f32 %v521_v6, %v485_v33  ;;  %v642_v52 = vadd.f32 %v626_v10, %v588_v39  ;;  %v575_v56 = vmul.f32 %v1663_v17, %v555_v31  ;;  %v713_v57 = vld [vmem:[#allocation2 + $0x52] sm:$0xff]  ;;  %v628_v48 = vmul.f32 %v1665_v18, %v450_v21  ;;  %v452_v22 = vld [vmem:[#allocation2 + $0x60] sm:$0xff] }
  0xf1   :  { %v433_v53 = vadd.f32 %v417_v37, %v381_v40  ;;  %v434_v59 = vadd.f32 %v418_v38, %v382_v47  ;;  %v629_v36 = vmul.f32 %v1665_v18, %v608_v45  ;;  %v680_v60 = vmul.f32 %v1667_v19, %v503_v27  ;;  %v505_v37 = vld [vmem:[#allocation2 + $0x61] sm:$0xff]  ;;  %v610_v47 = vld [vmem:[#allocation2 + $0x70] sm:$0xff] }
  0xf2   :  { %v589_v58 = vadd.f32 %v573_v9, %v537_v46  ;;  %v694_v62 = vadd.f32 %v678_v11, %v642_v52  ;;  %v681_v0 = vmul.f32 %v1667_v19, %v661_v51  ;;  %v732_v3 = vmul.f32 %v1672_v25, %v555_v31  ;;  %v557_v38 = vld [vmem:[#allocation2 + $0x62] sm:$0xff] }
  0xf3   :  { %v486_v63 = vadd.f32 %v470_v43, %v433_v53  ;;  %v487_v2 = vadd.f32 %v471_v44, %v434_v59  ;;  %v733_v4 = vmul.f32 %v1672_v25, %v713_v57  ;;  %v331_v7 = vmul.f32 %v450_v21, %v1617_v29  ;;  %v663_v53 = vld [vmem:[#allocation2 + $0x71] sm:$0xff] }
  0xf4   :  { %v643_v61 = vadd.f32 %v1694_v55, %v589_v58  ;;  %v746_v5 = vadd.f32 %v730_v15, %v694_v62  ;;  %v332_v8 = vmul.f32 %v608_v45, %v1617_v29  ;;  %v367_v11 = vmul.f32 %v503_v27, %v1619_v30  ;;  %v715_v59 = vld [vmem:[#allocation2 + $0x72] sm:$0xff] }
  0xf5   :  { %v538_v6 = vadd.f32 %v522_v49, %v486_v63  ;;  %v539_v10 = vadd.f32 %v523_v50, %v487_v2  ;;  %v368_v13 = vmul.f32 %v661_v51, %v1619_v30  ;;  %v419_v32 = vmul.f32 %v555_v31, %v1637_v41 }
  0xf6   :  { %v695_v9 = vadd.f32 %v679_v14, %v643_v61  ;;  %v768_v55 = vadd.f32 %v1736_v1, %v746_v5  ;;  %v420_v24 = vmul.f32 %v713_v57, %v1637_v41  ;;  %v383_v28 = vadd.f32 %v367_v11, %v331_v7 }
  0xf7   :  { %v590_v23 = vadd.f32 %v574_v54, %v538_v6  ;;  %v591_v33 = vadd.f32 %v575_v56, %v539_v10  ;;  %v384_v21 = vadd.f32 %v368_v13, %v332_v8  ;;  %v472_v39 = vmul.f32 %v608_v45, %v1656_v12  ;;  %v454_v10 = vld [vmem:[#allocation2 + $0x80] sm:$0xff] }
  0xf8   :  { %v747_v15 = vadd.f32 %v731_v20, %v695_v9  ;;  %v473_v27 = vmul.f32 %v1656_v12, %v452_v22  ;;  %v524_v40 = vmul.f32 %v661_v51, %v1660_v16  ;;  %v435_v46 = vadd.f32 %v419_v32, %v383_v28 }
  0xf9   :  { %v644_v14 = vadd.f32 %v628_v48, %v590_v23  ;;  %v645_v44 = vadd.f32 %v629_v36, %v591_v33  ;;  %v436_v31 = vadd.f32 %v420_v24, %v384_v21  ;;  %v525_v20 = vmul.f32 %v1660_v16, %v505_v37  ;;  %v507_v23 = vld [vmem:[#allocation2 + $0x81] sm:$0xff] }
  0xfa   :  { %v769_v43 = vadd.f32 %v1736_v1, %v747_v15  ;;  %v576_v50 = vmul.f32 %v713_v57, %v1663_v17  ;;  %v577_v52 = vmul.f32 %v1663_v17, %v557_v38  ;;  %v488_v56 = vadd.f32 %v472_v39, %v435_v46  ;;  %v559_v33 = vld [vmem:[#allocation2 + $0x82] sm:$0xff] }
  0xfb   :  { %v696_v49 = vadd.f32 %v680_v60, %v644_v14  ;;  %v697_v45 = vadd.f32 %v681_v0, %v645_v44  ;;  %v489_v58 = vadd.f32 %v473_v27, %v436_v31  ;;  %v630_v48 = vmul.f32 %v1665_v18, %v452_v22  ;;  %v352_v44 = vld [vmem:[#allocation2 + $0xb1] sm:$0xff] }
  0xfc   :  { %v784_v54 = vpack.c.bf16 %v769_v43, %v768_v55  ;;  %v631_v36 = vmul.f32 %v1665_v18, %v610_v47  ;;  %v682_v62 = vmul.f32 %v1667_v19, %v505_v37  ;;  %v540_v60 = vadd.f32 %v524_v40, %v488_v56  ;;  %v315_v43 = vld [vmem:[#allocation2 + $0xb0] sm:$0xff] }
  0xfd   :  { %v748_v51 = vadd.f32 %v732_v3, %v696_v49  ;;  %v749_v63 = vadd.f32 %v733_v4, %v697_v45  ;;  %v541_v57 = vadd.f32 %v525_v20, %v489_v58  ;;  %v683_v61 = vmul.f32 %v1667_v19, %v663_v53  ;;  %v404_v20 = vld [vmem:[#allocation2 + $0xb2] sm:$0xff] }
  0xfe   :  { %1356 = vmatprep.mubr.msk.bf16.mxu1 %vm98_vm1, %v784_v54  ;;  %v734_v0 = vmul.f32 %v1672_v25, %v557_v38  ;;  %v735_v5 = vmul.f32 %v1672_v25, %v715_v59  ;;  %v333_v3 = vmul.f32 %v452_v22, %v1617_v29  ;;  %v592_v7 = vadd.f32 %v576_v50, %v540_v60 }
  0xff   :  { %v770_v2 = vadd.f32 %v1736_v1, %v748_v51  ;;  %v771_v6 = vadd.f32 %v1736_v1, %v749_v63  ;;  %v593_v8 = vadd.f32 %v577_v52, %v541_v57  ;;  %v334_v9 = vmul.f32 %v610_v47, %v1617_v29 }
 0x100   :  { %v369_v4 = vmul.f32 %v505_v37, %v1619_v30  ;;  %v370_v11 = vmul.f32 %v663_v53, %v1619_v30  ;;  %v421_v13 = vmul.f32 %v557_v38, %v1637_v41  ;;  %v422_v55 = vmul.f32 %v715_v59, %v1637_v41 }
 0x101   :  { %v785_v32 = vpack.c.bf16 %v771_v6, %v770_v2  ;;  %v646_v24 = vadd.f32 %v630_v48, %v592_v7  ;;  %v647_v15 = vadd.f32 %v631_v36, %v593_v8  ;;  %v474_v22 = vmul.f32 %v610_v47, %v1656_v12 }
 0x102   :  { %v385_v28 = vadd.f32 %v369_v4, %v333_v3  ;;  %v386_v21 = vadd.f32 %v370_v11, %v334_v9  ;;  %v475_v14 = vmul.f32 %v1656_v12, %v454_v10  ;;  %v526_v39 = vmul.f32 %v663_v53, %v1660_v16  ;;  %v561_v4 = vld [vmem:[#allocation2 + $0xc2] sm:$0xff] }
 0x103   :  { %1357 = vmatmul.mubr.msk.bf16.vlgmr.msra.gmra.mrb[8].mxu1 %vm98_vm1, %v785_v32  ;;  %v698_v37 = vadd.f32 %v682_v62, %v646_v24  ;;  %v699_v27 = vadd.f32 %v683_v61, %v647_v15  ;;  %v527_v38 = vmul.f32 %v1660_v16, %v507_v23  ;;  %v578_v40 = vmul.f32 %v715_v59, %v1663_v17  ;;  %v456_v62 = vld [vmem:[#allocation2 + $0xc0] sm:$0xff] }
 0x104   :  { %v437_v46 = vadd.f32 %v421_v13, %v385_v28  ;;  %v438_v31 = vadd.f32 %v422_v55, %v386_v21  ;;  %v579_v47 = vmul.f32 %v1663_v17, %v559_v33  ;;  %v632_v49 = vmul.f32 %v1665_v18, %v454_v10  ;;  %v614_v13 = vld [vmem:[#allocation2 + $0xd0] sm:$0xff] }
 0x105   :  { %v750_v50 = vadd.f32 %v734_v0, %v698_v37  ;;  %v751_v52 = vadd.f32 %v735_v5, %v699_v27  ;;  %v684_v53 = vmul.f32 %v1667_v19, %v507_v23  ;;  %v736_v54 = vmul.f32 %v1672_v25, %v559_v33  ;;  %v509_v0 = vld [vmem:[#allocation2 + $0xc1] sm:$0xff]  ;;  %v667_v33 = vld [vmem:[#allocation2 + $0xd1] sm:$0xff] }
 0x106   :  { %v490_v45 = vadd.f32 %v474_v22, %v437_v46  ;;  %v491_v56 = vadd.f32 %v475_v14, %v438_v31  ;;  %v336_v58 = vmul.f32 %v1617_v29, %v315_v43  ;;  %v372_v59 = vmul.f32 %v1619_v30, %v352_v44  ;;  %v719_v21 = vld [vmem:[#allocation2 + $0xd2] sm:$0xff] }
 0x107   :  { %v772_v51 = vadd.f32 %v1736_v1, %v750_v50  ;;  %v773_v48 = vadd.f32 %v1736_v1, %v751_v52  ;;  %v424_v36 = vmul.f32 %v1637_v41, %v404_v20  ;;  %v476_v63 = vmul.f32 %v1656_v12, %v315_v43 }
 0x108   :  { %v542_v60 = vadd.f32 %v526_v39, %v490_v45  ;;  %v543_v57 = vadd.f32 %v527_v38, %v491_v56  ;;  %v388_v61 = vadd.f32 %v372_v59, %v336_v58  ;;  %v477_v2 = vmul.f32 %v1656_v12, %v456_v62  ;;  %v458_v45 = vld [vmem:[#allocation2 + $0xe0] sm:$0xff] }
 0x109   :  { %v786_v5 = vpack.c.bf16 %v773_v48, %v772_v51  ;;  %v492_v3 = vadd.f32 %v476_v63, %v1674_v26  ;;  %v528_v6 = vmul.f32 %v1660_v16, %v352_v44  ;;  %v529_v7 = vmul.f32 %v1660_v16, %v509_v0  ;;  %v511_v59 = vld [vmem:[#allocation2 + $0xe1] sm:$0xff] }
 0x10a   :  { %v594_v8 = vadd.f32 %v578_v40, %v542_v60  ;;  %v595_v9 = vadd.f32 %v579_v47, %v543_v57  ;;  %v440_v10 = vadd.f32 %v424_v36, %v388_v61  ;;  %v580_v11 = vmul.f32 %v1663_v17, %v404_v20  ;;  %v563_v57 = vld [vmem:[#allocation2 + $0xe2] sm:$0xff] }
 0x10b   :  { %1360 = vmatprep.mubr.msk.bf16.mxu1 %vm98_vm1, %v786_v5  ;;  %v544_v55 = vadd.f32 %v528_v6, %v492_v3  ;;  %v581_v23 = vmul.f32 %v1663_v17, %v561_v4  ;;  %v634_v32 = vmul.f32 %v1665_v18, %v456_v62  ;;  %v635_v26 = vmul.f32 %v1665_v18, %v614_v13 }
 0x10c   :  { %v648_v24 = vadd.f32 %v632_v49, %v594_v8  ;;  %v649_v15 = vadd.f32 %v1679_v34, %v595_v9  ;;  %v493_v22 = vadd.f32 %v477_v2, %v440_v10  ;;  %v686_v28 = vmul.f32 %v1667_v19, %v509_v0  ;;  %v616_v9 = vld [vmem:[#allocation2 + $0xf0] sm:$0xff] }
 0x10d   :  { %v596_v14 = vadd.f32 %v580_v11, %v544_v55  ;;  %v687_v39 = vmul.f32 %v1667_v19, %v667_v33  ;;  %v738_v37 = vmul.f32 %v1672_v25, %v561_v4  ;;  %v739_v27 = vmul.f32 %v1672_v25, %v719_v21  ;;  %v669_v55 = vld [vmem:[#allocation2 + $0xf1] sm:$0xff] }
 0x10e   :  { %v700_v38 = vadd.f32 %v684_v53, %v648_v24  ;;  %v701_v40 = vadd.f32 %v1682_v35, %v649_v15  ;;  %v545_v43 = vadd.f32 %v529_v7, %v493_v22  ;;  %v337_v44 = vmul.f32 %v456_v62, %v1617_v29  ;;  %v721_v15 = vld [vmem:[#allocation2 + $0xf2] sm:$0xff] }
 0x10f   :  { %v650_v46 = vadd.f32 %v634_v32, %v596_v14  ;;  %v338_v34 = vmul.f32 %v614_v13, %v1617_v29  ;;  %v373_v31 = vmul.f32 %v509_v0, %v1619_v30  ;;  %v374_v47 = vmul.f32 %v667_v33, %v1619_v30 }
 0x110   :  { %v752_v49 = vadd.f32 %v736_v54, %v700_v38  ;;  %v753_v20 = vadd.f32 %v1687_v42, %v701_v40  ;;  %v597_v50 = vadd.f32 %v581_v23, %v545_v43  ;;  %v425_v52 = vmul.f32 %v561_v4, %v1637_v41 }
 0x111   :  { %v702_v53 = vadd.f32 %v686_v28, %v650_v46  ;;  %v389_v56 = vadd.f32 %v373_v31, %v337_v44  ;;  %v390_v35 = vadd.f32 %v374_v47, %v338_v34  ;;  %v426_v58 = vmul.f32 %v719_v21, %v1637_v41  ;;  %v460_v47 = vld [vmem:[#allocation2 + $0x100] sm:$0xff] }
 0x112   :  { %v774_v51 = vadd.f32 %v1736_v1, %v752_v49  ;;  %v775_v48 = vadd.f32 %v1736_v1, %v753_v20  ;;  %v651_v36 = vadd.f32 %v635_v26, %v597_v50  ;;  %v478_v62 = vmul.f32 %v614_v13, %v1656_v12 }
 0x113   :  { %v754_v54 = vadd.f32 %v738_v37, %v702_v53  ;;  %v441_v63 = vadd.f32 %v425_v52, %v389_v56  ;;  %v442_v42 = vadd.f32 %v426_v58, %v390_v35  ;;  %v479_v60 = vmul.f32 %v1656_v12, %v458_v45  ;;  %v513_v52 = vld [vmem:[#allocation2 + $0x101] sm:$0xff] }
 0x114   :  { %v787_v61 = vpack.c.bf16 %v775_v48, %v774_v51  ;;  %v703_v2 = vadd.f32 %v687_v39, %v651_v36  ;;  %v530_v0 = vmul.f32 %v667_v33, %v1660_v16  ;;  %v531_v5 = vmul.f32 %v1660_v16, %v511_v59 }
 0x115   :  { %v776_v3 = vadd.f32 %v1736_v1, %v754_v54  ;;  %v494_v6 = vadd.f32 %v478_v62, %v441_v63  ;;  %v495_v7 = vadd.f32 %v479_v60, %v442_v42  ;;  %v582_v8 = vmul.f32 %v719_v21, %v1663_v17  ;;  %v618_v62 = vld [vmem:[#allocation2 + $0x110] sm:$0xff] }
 0x116   :  { %1361 = vmatmul.mubr.msk.bf16.gmra.mrb[12].mxu1 %vm98_vm1, %v787_v61  ;;  %v755_v10 = vadd.f32 %v739_v27, %v703_v2  ;;  %v583_v4 = vmul.f32 %v1663_v17, %v563_v57  ;;  %v636_v11 = vmul.f32 %v1665_v18, %v458_v45  ;;  %v637_v13 = vmul.f32 %v1665_v18, %v616_v9  ;;  %v671_v61 = vld [vmem:[#allocation2 + $0x111] sm:$0xff] }
 0x117   :  { %v546_v23 = vadd.f32 %v530_v0, %v494_v6  ;;  %v547_v32 = vadd.f32 %v531_v5, %v495_v7  ;;  %v688_v26 = vmul.f32 %v1667_v19, %v511_v59  ;;  %v689_v24 = vmul.f32 %v1667_v19, %v669_v55 }
 0x118   :  { %v777_v22 = vadd.f32 %v1736_v1, %v755_v10  ;;  %v740_v33 = vmul.f32 %v1672_v25, %v563_v57  ;;  %v741_v28 = vmul.f32 %v1672_v25, %v721_v15  ;;  %v339_v21 = vmul.f32 %v458_v45, %v1617_v29 }
 0x119   :  { %v598_v14 = vadd.f32 %v582_v8, %v546_v23  ;;  %v599_v39 = vadd.f32 %v583_v4, %v547_v32  ;;  %v340_v37 = vmul.f32 %v616_v9, %v1617_v29  ;;  %v375_v27 = vmul.f32 %v511_v59, %v1619_v30  ;;  %v565_v59 = vld [vmem:[#allocation2 + $0x102] sm:$0xff] }
 0x11a   :  { %v788_v38 = vpack.c.bf16 %v777_v22, %v776_v3  ;;  %v376_v40 = vmul.f32 %v669_v55, %v1619_v30  ;;  %v427_v43 = vmul.f32 %v563_v57, %v1637_v41  ;;  %v428_v44 = vmul.f32 %v721_v15, %v1637_v41  ;;  %v723_v3 = vld [vmem:[#allocation2 + $0x112] sm:$0xff]  ;;  %v462_v23 = vld [vmem:[#allocation2 + $0x120] sm:$0xff] }
 0x11b   :  { %v652_v46 = vadd.f32 %v636_v11, %v598_v14  ;;  %v653_v34 = vadd.f32 %v637_v13, %v599_v39  ;;  %v391_v31 = vadd.f32 %v375_v27, %v339_v21  ;;  %v480_v49 = vmul.f32 %v616_v9, %v1656_v12  ;;  %v515_v22 = vld [vmem:[#allocation2 + $0x121] sm:$0xff] }
 0x11c   :  { %1364 = vmatprep.mubr.msk.bf16.mxu1 %vm98_vm1, %v788_v38  ;;  %v392_v20 = vadd.f32 %v376_v40, %v340_v37  ;;  %v481_v50 = vmul.f32 %v1656_v12, %v460_v47  ;;  %v532_v45 = vmul.f32 %v669_v55, %v1660_v16  ;;  %v533_v58 = vmul.f32 %v1660_v16, %v513_v52  ;;  %v567_v27 = vld [vmem:[#allocation2 + $0x122] sm:$0xff] }
 0x11d   :  { %v704_v53 = vadd.f32 %v688_v26, %v652_v46  ;;  %v705_v56 = vadd.f32 %v689_v24, %v653_v34  ;;  %v443_v35 = vadd.f32 %v427_v43, %v391_v31  ;;  %v584_v48 = vmul.f32 %v721_v15, %v1663_v17 }
 0x11e   :  { %v444_v51 = vadd.f32 %v428_v44, %v392_v20  ;;  %v585_v36 = vmul.f32 %v1663_v17, %v565_v59  ;;  %v638_v54 = vmul.f32 %v1665_v18, %v460_v47  ;;  %v639_v57 = vmul.f32 %v1665_v18, %v618_v62  ;;  %v620_v44 = vld [vmem:[#allocation2 + $0x130] sm:$0xff] }
 0x11f   :  { %v756_v63 = vadd.f32 %v740_v33, %v704_v53  ;;  %v757_v42 = vadd.f32 %v741_v28, %v705_v56  ;;  %v496_v60 = vadd.f32 %v480_v49, %v443_v35  ;;  %v690_v0 = vmul.f32 %v1667_v19, %v513_v52 }
 0x120   :  { %v497_v2 = vadd.f32 %v481_v50, %v444_v51  ;;  %v691_v5 = vmul.f32 %v1667_v19, %v671_v61  ;;  %v742_v6 = vmul.f32 %v1672_v25, %v565_v59  ;;  %v341_v10 = vmul.f32 %v460_v47, %v1617_v29  ;;  %v673_v50 = vld [vmem:[#allocation2 + $0x131] sm:$0xff] }
 0x121   :  { %v778_v7 = vadd.f32 %v1736_v1, %v756_v63  ;;  %v779_v8 = vadd.f32 %v1736_v1, %v757_v42  ;;  %v548_v9 = vadd.f32 %v532_v45, %v496_v60  ;;  %v342_v11 = vmul.f32 %v618_v62, %v1617_v29 }
 0x122   :  { %v549_v4 = vadd.f32 %v533_v58, %v497_v2  ;;  %v377_v13 = vmul.f32 %v513_v52, %v1619_v30  ;;  %v378_v55 = vmul.f32 %v671_v61, %v1619_v30  ;;  %v429_v24 = vmul.f32 %v565_v59, %v1637_v41  ;;  %v725_v58 = vld [vmem:[#allocation2 + $0x132] sm:$0xff] }
 0x123   :  { %v789_v32 = vpack.c.bf16 %v779_v8, %v778_v7  ;;  %v600_v26 = vadd.f32 %v584_v48, %v548_v9  ;;  %v430_v15 = vmul.f32 %v723_v3, %v1637_v41  ;;  %v482_v14 = vmul.f32 %v618_v62, %v1656_v12 }
 0x124   :  { %v601_v33 = vadd.f32 %v585_v36, %v549_v4  ;;  %v393_v28 = vadd.f32 %v377_v13, %v341_v10  ;;  %v394_v21 = vadd.f32 %v378_v55, %v342_v11  ;;  %v743_v39 = vmul.f32 %v1672_v25, %v723_v3 }
 0x125   :  { %1365 = vmatmul.mubr.msk.bf16.gmra.mrb[16].mxu1 %vm98_vm1, %v789_v32  ;;  %v654_v29 = vadd.f32 %v638_v54, %v600_v26  ;;  %v483_v30 = vmul.f32 %v1656_v12, %v462_v23  ;;  %v534_v37 = vmul.f32 %v671_v61, %v1660_v16  ;;  %v535_v41 = vmul.f32 %v1660_v16, %v515_v22 }
 0x126   :  { %v655_v38 = vadd.f32 %v639_v57, %v601_v33  ;;  %v445_v40 = vadd.f32 %v429_v24, %v393_v28  ;;  %v446_v43 = vadd.f32 %v430_v15, %v394_v21  ;;  %v586_v34 = vmul.f32 %v723_v3, %v1663_v17  ;;  %v1890_v15 = vld [vmem:[%s1951_s7] ss:$0 sm:$0xff]  ;;  %s1441_s7 = smov [#allocation3]  }
 0x127   :  { %v706_v46 = vadd.f32 %v690_v0, %v654_v29  ;;  %v587_v20 = vmul.f32 %v1663_v17, %v567_v27  ;;  %v641_v12 = vmul.f32 %v1665_v18, %v620_v44  ;;  %v640_v35 = vmul.f32 %v1665_v18, %v462_v23  ;;  %s1223_s28 = sshll.u32 %s1441_s7, 4  ;;  %s1224_s28 = int_to_ptr.vmem [resolvable:$true] %s1223_s28 }
 0x128   :  { %v707_v31 = vadd.f32 %v691_v5, %v655_v38  ;;  %v498_v47 = vadd.f32 %v482_v14, %v445_v40  ;;  %v499_v49 = vadd.f32 %v483_v30, %v446_v43  ;;  %v693_v59 = vmul.f32 %v1667_v19, %v673_v50  ;;  %s1416_s29 = scalar_lea.vmem %s1224_s28, 1024  ;;  %p1421_p1 = scmp.lt.s32.totalorder %s1224_s28, %s1224_s28 }
 0x129   :  { %v758_v52 = vadd.f32 %v742_v6, %v706_v46  ;;  %v692_v17 = vmul.f32 %v1667_v19, %v515_v22  ;;  %v745_v62 = vmul.f32 %v1672_v25, %v725_v58  ;;  %v744_v60 = vmul.f32 %v1672_v25, %v567_v27  ;;  %v1376_v19 = vpop.f32.mrb[8].mxu0  ;;  %p1417_p0 = scmp.ne.s32.totalorder %s1224_s28, %s1416_s29  ;;  %p1422_p2 = scmp.lt.s32.totalorder %s1416_s29, %s1416_s29 }
 0x12a   :  { %v759_v45 = vadd.f32 %v743_v39, %v707_v31  ;;  %v550_v53 = vadd.f32 %v534_v37, %v498_v47  ;;  %v551_v56 = vadd.f32 %v535_v41, %v499_v49  ;;  %v1058_v6 = vpop.f32.mrb[9].mxu0 }
 0x12b   :  { %v780_v16 = vadd.f32 %v1736_v1, %v758_v52  ;;  %v1377_v7 = vpop.f32.mrb[10].mxu0  ;;  %p1423_p3 = por %p1422_p2, %p1421_p1 }
 0x12c   :  { %v781_v51 = vadd.f32 %v1736_v1, %v759_v45  ;;  %v602_v48 = vadd.f32 %v586_v34, %v550_v53  ;;  %v603_v36 = vadd.f32 %v587_v20, %v551_v56  ;;  %v1061_v8 = vpop.f32.mrb[11].mxu0 }
 0x12d   :  { %v1380_v9 = vpop.f32.mrb[12].mxu0  ;;  %p1424_p4 = pnand %p1423_p3, %p1417_p0 }
 0x12e   :  { %v790_v54 = vpack.c.bf16 %v781_v51, %v780_v16  ;;  %v656_v63 = vadd.f32 %v640_v35, %v602_v48  ;;  %v657_v42 = vadd.f32 %v641_v12, %v603_v36  ;;  %v1074_v10 = vpop.f32.mrb[13].mxu0 }
 0x12f   :  { %v1381_v25 = vpop.f32.mrb[14].mxu0 }
 0x130   :  { %1368 = vmatprep.mubr.msk.bf16.mxu1 %vm98_vm1, %v790_v54  ;;  %v708_v18 = vadd.f32 %v692_v17, %v656_v63  ;;  %v709_v57 = vadd.f32 %v693_v59, %v657_v42  ;;  %v1077_v4 = vpop.f32.mrb[15].mxu0 }
 0x131   :  { %v1871_v11 = vpop.f32.mrb[16].mxu0 }
 0x132   :  { %v760_v61 = vadd.f32 %v744_v60, %v708_v18  ;;  %v761_v2 = vadd.f32 %v745_v62, %v709_v57  ;;  %v1873_v13 = vpop.f32.mrb[17].mxu0 }
 0x133   :  { %v1875_v55 = vpop.f32.mrb[18].mxu0 }
 0x134   :  { %v782_v0 = vadd.f32 %v1736_v1, %v760_v61  ;;  %v783_v5 = vadd.f32 %v1736_v1, %v761_v2  ;;  %v1877_v23 = vpop.f32.mrb[19].mxu0 }
 0x135   :  { %v1879_v1 = vpop.f32.mrb[20].mxu0 }
 0x136   :  { %v791_v3 = vpack.c.bf16 %v783_v5, %v782_v0  ;;  %v1881_v32 = vpop.f32.mrb[21].mxu0 }
 0x137   :  { %v1883_v26 = vpop.f32.mrb[22].mxu0 }
 0x138   :  { %1369 = vmatmul.mubr.msk.bf16.gmra.mrb[20].mxu1 %vm98_vm1, %v791_v3  ;;  %v1885_v24 = vpop.f32.mrb[23].mxu0 }
 0x1d6   :  { %v1358_v22 = vpop.f32.mrb[8].mxu1 }
 0x1d7   :  { %v870_v33 = vadd.f32 %v1358_v22, %v1890_v15  ;;  %v861_v28 = vpop.f32.mrb[9].mxu1 }
 0x1d8   :  { %v862_v21 = vadd.f32 %v1890_v15, %v861_v28  ;;  %v1359_v14 = vpop.f32.mrb[10].mxu1 }
 0x1d9   :  { %v926_v29 = vmax.f32 %v870_v33, 0.0  ;;  %v873_v39 = vadd.f32 %v1359_v14, %v1890_v15  ;;  %v864_v30 = vpop.f32.mrb[11].mxu1 }
 0x1da   :  { %v924_v37 = vmax.f32 %v862_v21, 0.0  ;;  %v865_v27 = vadd.f32 %v1890_v15, %v864_v30 }
 0x1db   :  { %v1123_v38 = vadd.f32 %v1376_v19, %v926_v29  ;;  %v927_v40 = vmax.f32 %v873_v39, 0.0 }
 0x1dc   :  { %v1121_v43 = vadd.f32 %v1058_v6, %v924_v37  ;;  %v925_v41 = vmax.f32 %v865_v27, 0.0 }
 0x1dd   :  { %v1295_v44 = vpack.c.bf16 %v1123_v38, %v1123_v38  ;;  %v1124_v46 = vadd.f32 %v1377_v7, %v927_v40 }
 0x1de   :  { %v1293_v34 = vpack.c.bf16 %v1121_v43, %v1121_v43  ;;  %v1122_v31 = vadd.f32 %v1061_v8, %v925_v41 }
 0x1df   :  { %1204 = vst.msk [vmem:[#allocation3 + $0x8] sm:$0xf] %vm1201_vm3, %v1295_v44  ;;  %v1296_v47 = vpack.c.bf16 %v1124_v46, %v1124_v46 }
 0x1e0   :  { %1202 = vst.msk [vmem:[#allocation3] sm:$0xf] %vm1201_vm3, %v1293_v34  ;;  %v1294_v49 = vpack.c.bf16 %v1122_v31, %v1122_v31 }
 0x1e1   :  { %1205 = vst.msk [vmem:[#allocation3 + $0xc] sm:$0xf] %vm1201_vm3, %v1296_v47 }
 0x1e2   :  { %1203 = vst.msk [vmem:[#allocation3 + $0x4] sm:$0xf] %vm1201_vm3, %v1294_v49 }
 0x1e9   :  { %v1362_v20 = vpop.f32.mrb[12].mxu1 }
 0x1ea   :  { %v886_v50 = vadd.f32 %v1362_v20, %v1890_v15  ;;  %v877_v52 = vpop.f32.mrb[13].mxu1 }
 0x1eb   :  { %v878_v12 = vadd.f32 %v1890_v15, %v877_v52  ;;  %v1363_v45 = vpop.f32.mrb[14].mxu1 }
 0x1ec   :  { %v930_v53 = vmax.f32 %v886_v50, 0.0  ;;  %v889_v56 = vadd.f32 %v1363_v45, %v1890_v15  ;;  %v880_v35 = vpop.f32.mrb[15].mxu1 }
 0x1ed   :  { %v928_v58 = vmax.f32 %v878_v12, 0.0  ;;  %v881_v16 = vadd.f32 %v1890_v15, %v880_v35 }
 0x1ee   :  { %v1127_v59 = vadd.f32 %v1380_v9, %v930_v53  ;;  %v931_v51 = vmax.f32 %v889_v56, 0.0 }
 0x1ef   :  { %v1125_v48 = vadd.f32 %v1074_v10, %v928_v58  ;;  %v929_v36 = vmax.f32 %v881_v16, 0.0 }
 0x1f0   :  { %v1299_v17 = vpack.c.bf16 %v1127_v59, %v1127_v59  ;;  %v1128_v62 = vadd.f32 %v1381_v25, %v931_v51 }
 0x1f1   :  { %v1297_v54 = vpack.c.bf16 %v1125_v48, %v1125_v48  ;;  %v1126_v63 = vadd.f32 %v1077_v4, %v929_v36 }
 0x1f2   :  { %1208 = vst.msk [vmem:[#allocation3 + $0x18] sm:$0xf] %vm1201_vm3, %v1299_v17  ;;  %v1300_v42 = vpack.c.bf16 %v1128_v62, %v1128_v62 }
 0x1f3   :  { %1206 = vst.msk [vmem:[#allocation3 + $0x10] sm:$0xf] %vm1201_vm3, %v1297_v54  ;;  %v1298_v60 = vpack.c.bf16 %v1126_v63, %v1126_v63 }
 0x1f4   :  { %1209 = vst.msk [vmem:[#allocation3 + $0x1c] sm:$0xf] %vm1201_vm3, %v1300_v42 }
 0x1f5   :  { %1207 = vst.msk [vmem:[#allocation3 + $0x14] sm:$0xf] %vm1201_vm3, %v1298_v60 }
 0x1f8   :  { %v1366_v18 = vpop.f32.mrb[16].mxu1 }
 0x1f9   :  { %v902_v57 = vadd.f32 %v1366_v18, %v1890_v15  ;;  %v893_v61 = vpop.f32.mrb[17].mxu1 }
 0x1fa   :  { %v894_v2 = vadd.f32 %v1890_v15, %v893_v61  ;;  %v1367_v0 = vpop.f32.mrb[18].mxu1 }
 0x1fb   :  { %v934_v5 = vmax.f32 %v902_v57, 0.0  ;;  %v905_v3 = vadd.f32 %v1367_v0, %v1890_v15  ;;  %v896_v19 = vpop.f32.mrb[19].mxu1 }
 0x1fc   :  { %v932_v6 = vmax.f32 %v894_v2, 0.0  ;;  %v897_v7 = vadd.f32 %v1890_v15, %v896_v19 }
 0x1fd   :  { %v1131_v8 = vadd.f32 %v1871_v11, %v934_v5  ;;  %v935_v9 = vmax.f32 %v905_v3, 0.0 }
 0x1fe   :  { %v1129_v10 = vadd.f32 %v1873_v13, %v932_v6  ;;  %v933_v25 = vmax.f32 %v897_v7, 0.0 }
 0x1ff   :  { %v1303_v4 = vpack.c.bf16 %v1131_v8, %v1131_v8  ;;  %v1132_v22 = vadd.f32 %v1875_v55, %v935_v9 }
 0x200   :  { %v1301_v33 = vpack.c.bf16 %v1129_v10, %v1129_v10  ;;  %v1130_v28 = vadd.f32 %v1877_v23, %v933_v25 }
 0x201   :  { %1212 = vst.msk [vmem:[#allocation3 + $0x28] sm:$0xf] %vm1201_vm3, %v1303_v4  ;;  %v1304_v21 = vpack.c.bf16 %v1132_v22, %v1132_v22 }
 0x202   :  { %1210 = vst.msk [vmem:[#allocation3 + $0x20] sm:$0xf] %vm1201_vm3, %v1301_v33  ;;  %v1302_v14 = vpack.c.bf16 %v1130_v28, %v1130_v28 }
 0x203   :  { %1213 = vst.msk [vmem:[#allocation3 + $0x2c] sm:$0xf] %vm1201_vm3, %v1304_v21 }
 0x204   :  { %1211 = vst.msk [vmem:[#allocation3 + $0x24] sm:$0xf] %vm1201_vm3, %v1302_v14 }
 0x20b   :  { %v1370_v11 = vpop.f32.mrb[20].mxu1 }
 0x20c   :  { %v918_v13 = vadd.f32 %v1370_v11, %v1890_v15  ;;  %v909_v29 = vpop.f32.mrb[21].mxu1 }
 0x20d   :  { %v910_v39 = vadd.f32 %v1890_v15, %v909_v29  ;;  %v1371_v55 = vpop.f32.mrb[22].mxu1 }
 0x20e   :  { %v938_v30 = vmax.f32 %v918_v13, 0.0  ;;  %v921_v23 = vadd.f32 %v1371_v55, %v1890_v15  ;;  %v912_v37 = vpop.f32.mrb[23].mxu1 }
 0x20f   :  { %v936_v27 = vmax.f32 %v910_v39, 0.0  ;;  %v913_v38 = vadd.f32 %v1890_v15, %v912_v37 }
 0x210   :  { %v1135_v40 = vadd.f32 %v1879_v1, %v938_v30  ;;  %v939_v43 = vmax.f32 %v921_v23, 0.0 }
 0x211   :  { %v1133_v41 = vadd.f32 %v1881_v32, %v936_v27  ;;  %v937_v44 = vmax.f32 %v913_v38, 0.0 }
 0x212   :  { %v1307_v46 = vpack.c.bf16 %v1135_v40, %v1135_v40  ;;  %v1136_v34 = vadd.f32 %v1883_v26, %v939_v43 }
 0x213   :  { %v1305_v31 = vpack.c.bf16 %v1133_v41, %v1133_v41  ;;  %v1134_v47 = vadd.f32 %v1885_v24, %v937_v44 }
 0x214   :  { %1216 = vst.msk [vmem:[#allocation3 + $0x38] sm:$0xf] %vm1201_vm3, %v1307_v46  ;;  %v1308_v49 = vpack.c.bf16 %v1136_v34, %v1136_v34 }
 0x215   :  { %1214 = vst.msk [vmem:[#allocation3 + $0x30] sm:$0xf] %vm1201_vm3, %v1305_v31  ;;  %v1306_v15 = vpack.c.bf16 %v1134_v47, %v1134_v47 }
 0x216   :  { %1217 = vst.msk [vmem:[#allocation3 + $0x3c] sm:$0xf] %vm1201_vm3, %v1308_v49 }
 0x217   :  { %1215 = vst.msk [vmem:[#allocation3 + $0x34] sm:$0xf] %vm1201_vm3, %v1306_v15 }
 0x218   :  { %1427 = shalt.err (!%p1424_p4)
}
 0x219   :  { %s1428_s6 = scalar_lea.hbm %s1953_s9, 1024 }
 0x21a   :  { %p1429_p5 = scmp.ne.s32.totalorder %s1953_s9, %s1428_s6  ;;  %p1432_p6 = scmp.lt.u32.totalorder %s1428_s6, %s1953_s9 }
 0x21c   :  { %p1434_p7 = pnand %p1432_p6, %p1429_p5 }
 0x21e   :  { %1437 = shalt.err (!%p1434_p7)
}
 0x21f   :  { %s1442_s14 = smov 64   ;;  %s1443_s2 = smov 4  }
 0x220   :  { %1229 = dma.vmem_to_hbm [thread:$0]  %s1224_s28, 1024, %s1953_s9, [#allocation4], %s1442_s14, %s1442_s14, %s1443_s2  }
 0x221   :  { %1438 = dma.done.wait [#allocation4], 1024  }
 0x222   :  { %1439 = vsyncadd [#allocation4], 4294966272 }
 0x223   :  { %1233 = vsyncpa [#allocation4], 1 }

</bundles_post_ra>
